<compile_context>
chip_gen: v7x
topology: tpu7x:2x2x1
jax: 0.10.0
libtpu: 0.0.40
codegen_flags: <defaults>
</compile_context>

<pallas_src>
import functools

import jax
import jax.numpy as jnp
from jax.experimental import pallas as pl
from jax.experimental.pallas import tpu as pltpu


# ---------------------------------------------------------------------------
# Kernel: whole image of  conv3x3 (3 shifted sub-matmuls) + folded-BN + ReLU
#         + 2x2 maxpool, stored lane-dense as (Ho, Wo*Cout)
# ---------------------------------------------------------------------------
def _conv_bn_relu_pool_kernel(xcol_ref, w_ref, scale_ref, shift_ref, o_ref, *,
                              h, w, cin, cout):
    # xcol_ref : (H+2, W, 3*Cin) bf16  padded rows, 3 horizontal taps in lanes
    # w_ref    : (9*Cin, Cout)   bf16  rows ordered (dy, dx, ci)
    # scale_ref: (1, Cout)       f32   gamma / sqrt(var + eps)
    # shift_ref: (1, Cout)       f32   beta + (conv_bias - mean) * scale
    # o_ref    : (Ho, Wo*Cout)   lane-dense pooled output
    kc = 3 * cin
    ho, wo = h // 2, w // 2

    # Conv as 3 vertically-shifted sub-matmuls (full dx/ci contraction packed
    # into K = 3*Cin), f32 MXU accumulation. M = H*W per matmul.
    acc = jnp.zeros((h * w, cout), jnp.float32)
    for dy in range(3):
        xs = xcol_ref[dy:dy + h, :, :].reshape(h * w, kc)
        acc = acc + jnp.dot(xs, w_ref[dy * kc:(dy + 1) * kc, :],
                            preferred_element_type=jnp.float32)

    # Folded BatchNorm (eval-mode) + ReLU epilogue in f32.
    y = jnp.maximum(acc * scale_ref[...] + shift_ref[...], 0.0)
    y = y.reshape(h, w, cout)

    # 2x2 max pool, stride 2.
    y = y.reshape(h, wo, 2, cout)
    y = jnp.maximum(y[:, :, 0, :], y[:, :, 1, :])     # pool over W
    y = y.reshape(ho, 2, wo, cout)
    y = jnp.maximum(y[:, 0, :, :], y[:, 1, :, :])     # pool over H

    # Lane-dense store: last dim Wo*Cout is a large multiple of 128.
    o_ref[...] = y.reshape(ho, wo * cout).astype(o_ref.dtype)


# ---------------------------------------------------------------------------
# Wrapper
# ---------------------------------------------------------------------------
def conv_block(x_nchw, conv_w, conv_b, gamma, beta, mean, var, *, eps=1e-5,
               compute_dtype=jnp.bfloat16, out_dtype=jnp.float32):
    """ConvBlock forward: Conv3x3(pad=1) -> BN(eval) -> ReLU -> MaxPool2x2.

    Input/Output in PyTorch NCHW layout.
    """
    b, cin, h, w = x_nchw.shape
    cout = conv_w.shape[0]
    # TODO(synk): PyTorch MaxPool2d(2,2) floors odd spatial dims; this kernel
    # requires even H and W.
    assert h % 2 == 0 and w % 2 == 0, "even spatial dims required"
    ho, wo = h // 2, w // 2

    # Lane-padding-aware VMEM estimate for the whole-image tile (inputs and
    # outputs are each double-buffered by the pipeline).
    lane = lambda n: -(-n // 128) * 128
    sub = lambda n: -(-n // 8) * 8
    in_tile = (h + 2) * sub(w) * lane(3 * cin) * jnp.dtype(compute_dtype).itemsize
    out_tile = sub(ho) * lane(wo * cout) * jnp.dtype(out_dtype).itemsize
    acc_tile = sub(h * w) * lane(cout) * 4
    vmem_est = 2 * in_tile + 2 * out_tile + acc_tile
    # TODO(synk): when this exceeds the budget (large images / Cin), split H
    # into overlapping row strips instead of asserting.
    assert vmem_est <= 16 * 1024 * 1024, f"whole-image tile too big: {vmem_est} B"

    # NCHW -> NHWC, zero-pad the 1-pixel halo, pack ONLY the 3 horizontal taps
    # into the lane axis (3x HBM inflation instead of 9x); cast to bf16.
    x = jnp.transpose(x_nchw, (0, 2, 3, 1))
    xp = jnp.pad(x, ((0, 0), (1, 1), (1, 1), (0, 0)))
    taps = [xp[:, :, dx:dx + w, :] for dx in range(3)]
    xcol = jnp.concatenate(taps, axis=-1).astype(compute_dtype)  # (B, H+2, W, 3*Cin)

    # torch conv weight (Cout, Cin, 3, 3) -> (9*Cin, Cout), rows ordered (dy, dx, ci).
    wk = jnp.transpose(conv_w, (2, 3, 1, 0)).reshape(9 * cin, cout)
    wk = wk.astype(compute_dtype)

    # Eval-mode BatchNorm folded with the conv bias into per-channel scale/shift.
    scale = (gamma / jnp.sqrt(var + eps)).astype(jnp.float32)
    shift = (beta + (conv_b - mean) * scale).astype(jnp.float32)

    flops = 2 * b * h * w * 9 * cin * cout
    bytes_accessed = (xcol.size * jnp.dtype(compute_dtype).itemsize
                      + wk.size * jnp.dtype(compute_dtype).itemsize
                      + 2 * cout * 4
                      + b * ho * wo * cout * jnp.dtype(out_dtype).itemsize)
    cost = pl.CostEstimate(flops=int(flops), transcendentals=0,
                           bytes_accessed=int(bytes_accessed))

    kernel = functools.partial(_conv_bn_relu_pool_kernel,
                               h=h, w=w, cin=cin, cout=cout)
    out = pl.pallas_call(
        kernel,
        out_shape=jax.ShapeDtypeStruct((b, ho, wo * cout), out_dtype),
        grid=(b,),   # single balanced 1-D parallel axis (v7x megacore friendly)
        in_specs=[
            # Whole padded image (all H+2 rows) for this batch item.
            pl.BlockSpec((None, h + 2, w, 3 * cin), lambda i: (i, 0, 0, 0)),
            # Weights / BN scale+shift: constant index_map -> VMEM-resident.
            pl.BlockSpec((9 * cin, cout), lambda i: (0, 0)),
            pl.BlockSpec((1, cout), lambda i: (0, 0)),
            pl.BlockSpec((1, cout), lambda i: (0, 0)),
        ],
        out_specs=pl.BlockSpec((None, ho, wo * cout), lambda i: (i, 0, 0)),
        compiler_params=pltpu.CompilerParams(
            dimension_semantics=("parallel",),
        ),
        cost_estimate=cost,
    )(xcol, wk, scale.reshape(1, cout), shift.reshape(1, cout))

    # Free HBM view back to NHWC, then to torch NCHW.
    out = out.reshape(b, ho, wo, cout)
    return jnp.transpose(out, (0, 3, 1, 2))


# ---------------------------------------------------------------------------
# Pure-JAX reference (f32) for correctness checking
# ---------------------------------------------------------------------------
def conv_block_reference(x_nchw, conv_w, conv_b, gamma, beta, mean, var, eps=1e-5):
    y = jax.lax.conv_general_dilated(
        x_nchw, conv_w, window_strides=(1, 1), padding=((1, 1), (1, 1)),
        dimension_numbers=("NCHW", "OIHW", "NCHW"),
        precision=jax.lax.Precision.HIGHEST)
    y = y + conv_b[None, :, None, None]
    y = (y - mean[None, :, None, None]) / jnp.sqrt(var[None, :, None, None] + eps)
    y = y * gamma[None, :, None, None] + beta[None, :, None, None]
    y = jnp.maximum(y, 0.0)
    b, c, h, w = y.shape
    return y.reshape(b, c, h // 2, 2, w // 2, 2).max(axis=(3, 5))


# ---------------------------------------------------------------------------
if __name__ == "__main__":
    B, C_IN, C_OUT, H, W = 2, 4, 32, 16, 16   # small demo shapes (NCHW)
    key = jax.random.PRNGKey(0)
    kx, kw, kb, kg, kbe, km = jax.random.split(key, 6)

    x = jax.random.normal(kx, (B, C_IN, H, W), jnp.float32)
    bound = 1.0 / (C_IN * 9) ** 0.5
    conv_w = jax.random.uniform(kw, (C_OUT, C_IN, 3, 3), jnp.float32, -bound, bound)
    conv_b = jax.random.uniform(kb, (C_OUT,), jnp.float32, -bound, bound)
    gamma = 1.0 + 0.1 * jax.random.normal(kg, (C_OUT,), jnp.float32)
    beta = 0.1 * jax.random.normal(kbe, (C_OUT,), jnp.float32)
    mean = 0.1 * jax.random.normal(km, (C_OUT,), jnp.float32)
    var = jnp.ones((C_OUT,), jnp.float32)

    fwd = jax.jit(lambda inp: conv_block(inp, conv_w, conv_b, gamma, beta, mean, var))
    out = jax.block_until_ready(fwd(x))

    assert out.shape == (B, C_OUT, H // 2, W // 2), out.shape
    assert out.dtype == jnp.float32

    ref = conv_block_reference(x, conv_w, conv_b, gamma, beta, mean, var)
    err = float(jnp.max(jnp.abs(out - ref)))
    assert err < 2e-2, f"max abs err vs reference: {err}"

    print("KERNEL_OK")
</pallas_src>

<mosaic_0001>
module attributes {stable_mosaic.version = 11 : i64} {
  func.func @_conv_bn_relu_pool_kernel(%arg0: i32, %arg1: memref<1x18x16x12xbf16, #tpu.memory_space<vmem>>, %arg2: memref<36x32xbf16, #tpu.memory_space<vmem>>, %arg3: memref<1x32xf32, #tpu.memory_space<vmem>>, %arg4: memref<1x32xf32, #tpu.memory_space<vmem>>, %arg5: memref<1x8x256xf32, #tpu.memory_space<vmem>>) attributes {dimension_semantics = [#tpu.dimension_semantics<parallel>], iteration_bounds = array<i64: 2>, scalar_prefetch = 0 : i64, scratch_operands = 0 : i64, tpu.core_type = #tpu.core_type<tc>, window_params = [{transform_indices = @transform_0, window_bounds = array<i64: 1, 18, 16, 12>}, {pipeline_mode = #tpu.pipeline_mode<synchronous>, transform_indices = @transform_1, window_bounds = array<i64: 36, 32>}, {pipeline_mode = #tpu.pipeline_mode<synchronous>, transform_indices = @transform_2, window_bounds = array<i64: 1, 32>}, {pipeline_mode = #tpu.pipeline_mode<synchronous>, transform_indices = @transform_3, window_bounds = array<i64: 1, 32>}, {transform_indices = @transform_4, window_bounds = array<i64: 1, 8, 256>}]} {
    %cst = arith.constant 0.000000e+00 : f32
    %0 = vector.broadcast %cst : f32 to vector<256x32xf32>
    %c0 = arith.constant 0 : index
    %c0_0 = arith.constant 0 : index
    %c0_1 = arith.constant 0 : index
    %c0_2 = arith.constant 0 : index
    %1 = vector.load %arg1[%c0, %c0_0, %c0_1, %c0_2] : memref<1x18x16x12xbf16, #tpu.memory_space<vmem>>, vector<1x16x16x12xbf16>
    %2 = vector.shape_cast %1 : vector<1x16x16x12xbf16> to vector<16x16x12xbf16>
    %3 = vector.shape_cast %2 : vector<16x16x12xbf16> to vector<256x12xbf16>
    %c0_3 = arith.constant 0 : index
    %c0_4 = arith.constant 0 : index
    %4 = vector.load %arg2[%c0_3, %c0_4] : memref<36x32xbf16, #tpu.memory_space<vmem>>, vector<12x32xbf16>
    %cst_5 = arith.constant dense<0.000000e+00> : vector<256x32xf32>
    %5 = tpu.matmul %3, %4, %cst_5 {dimension_numbers = #tpu.dot_dimension_numbers<[1], [0], [0], [1], [0, 0, 1, 1], [], []>} : vector<256x12xbf16>, vector<12x32xbf16>, vector<256x32xf32> -> vector<256x32xf32>
    %6 = arith.addf %0, %5 : vector<256x32xf32>
    %c0_6 = arith.constant 0 : index
    %c1 = arith.constant 1 : index
    %c0_7 = arith.constant 0 : index
    %c0_8 = arith.constant 0 : index
    %7 = vector.load %arg1[%c0_6, %c1, %c0_7, %c0_8] : memref<1x18x16x12xbf16, #tpu.memory_space<vmem>>, vector<1x16x16x12xbf16>
    %8 = vector.shape_cast %7 : vector<1x16x16x12xbf16> to vector<16x16x12xbf16>
    %9 = vector.shape_cast %8 : vector<16x16x12xbf16> to vector<256x12xbf16>
    %c12 = arith.constant 12 : index
    %c0_9 = arith.constant 0 : index
    %10 = vector.load %arg2[%c12, %c0_9] : memref<36x32xbf16, #tpu.memory_space<vmem>>, vector<12x32xbf16>
    %cst_10 = arith.constant dense<0.000000e+00> : vector<256x32xf32>
    %11 = tpu.matmul %9, %10, %cst_10 {dimension_numbers = #tpu.dot_dimension_numbers<[1], [0], [0], [1], [0, 0, 1, 1], [], []>} : vector<256x12xbf16>, vector<12x32xbf16>, vector<256x32xf32> -> vector<256x32xf32>
    %12 = arith.addf %6, %11 : vector<256x32xf32>
    %c0_11 = arith.constant 0 : index
    %c2 = arith.constant 2 : index
    %c0_12 = arith.constant 0 : index
    %c0_13 = arith.constant 0 : index
    %13 = vector.load %arg1[%c0_11, %c2, %c0_12, %c0_13] : memref<1x18x16x12xbf16, #tpu.memory_space<vmem>>, vector<1x16x16x12xbf16>
    %14 = vector.shape_cast %13 : vector<1x16x16x12xbf16> to vector<16x16x12xbf16>
    %15 = vector.shape_cast %14 : vector<16x16x12xbf16> to vector<256x12xbf16>
    %c24 = arith.constant 24 : index
    %c0_14 = arith.constant 0 : index
    %16 = vector.load %arg2[%c24, %c0_14] : memref<36x32xbf16, #tpu.memory_space<vmem>>, vector<12x32xbf16>
    %cst_15 = arith.constant dense<0.000000e+00> : vector<256x32xf32>
    %17 = tpu.matmul %15, %16, %cst_15 {dimension_numbers = #tpu.dot_dimension_numbers<[1], [0], [0], [1], [0, 0, 1, 1], [], []>} : vector<256x12xbf16>, vector<12x32xbf16>, vector<256x32xf32> -> vector<256x32xf32>
    %18 = arith.addf %12, %17 : vector<256x32xf32>
    %c0_16 = arith.constant 0 : index
    %c0_17 = arith.constant 0 : index
    %19 = vector.load %arg3[%c0_16, %c0_17] : memref<1x32xf32, #tpu.memory_space<vmem>>, vector<1x32xf32>
    %20 = vector.broadcast %19 : vector<1x32xf32> to vector<256x32xf32>
    %21 = arith.mulf %18, %20 : vector<256x32xf32>
    %c0_18 = arith.constant 0 : index
    %c0_19 = arith.constant 0 : index
    %22 = vector.load %arg4[%c0_18, %c0_19] : memref<1x32xf32, #tpu.memory_space<vmem>>, vector<1x32xf32>
    %23 = vector.broadcast %22 : vector<1x32xf32> to vector<256x32xf32>
    %24 = arith.addf %21, %23 : vector<256x32xf32>
    %cst_20 = arith.constant 0.000000e+00 : f32
    %25 = vector.broadcast %cst_20 : f32 to vector<256x32xf32>
    %26 = arith.maximumf %24, %25 : vector<256x32xf32>
    %27 = vector.shape_cast %26 : vector<256x32xf32> to vector<16x16x32xf32>
    %28 = vector.shape_cast %27 : vector<16x16x32xf32> to vector<16x8x2x32xf32>
    %29 = vector.extract_strided_slice %28 {offsets = [0, 0, 0, 0], sizes = [16, 8, 1, 32], strides = [1, 1, 1, 1]} : vector<16x8x2x32xf32> to vector<16x8x1x32xf32>
    %30 = vector.shape_cast %29 : vector<16x8x1x32xf32> to vector<16x8x32xf32>
    %31 = vector.extract_strided_slice %28 {offsets = [0, 0, 1, 0], sizes = [16, 8, 1, 32], strides = [1, 1, 1, 1]} : vector<16x8x2x32xf32> to vector<16x8x1x32xf32>
    %32 = vector.shape_cast %31 : vector<16x8x1x32xf32> to vector<16x8x32xf32>
    %33 = arith.maximumf %30, %32 : vector<16x8x32xf32>
    %34 = vector.shape_cast %33 : vector<16x8x32xf32> to vector<8x2x8x32xf32>
    %35 = vector.extract_strided_slice %34 {offsets = [0, 0, 0, 0], sizes = [8, 1, 8, 32], strides = [1, 1, 1, 1]} : vector<8x2x8x32xf32> to vector<8x1x8x32xf32>
    %36 = vector.shape_cast %35 : vector<8x1x8x32xf32> to vector<8x8x32xf32>
    %37 = vector.extract_strided_slice %34 {offsets = [0, 1, 0, 0], sizes = [8, 1, 8, 32], strides = [1, 1, 1, 1]} : vector<8x2x8x32xf32> to vector<8x1x8x32xf32>
    %38 = vector.shape_cast %37 : vector<8x1x8x32xf32> to vector<8x8x32xf32>
    %39 = arith.maximumf %36, %38 : vector<8x8x32xf32>
    %40 = vector.shape_cast %39 : vector<8x8x32xf32> to vector<8x256xf32>
    %c0_21 = arith.constant 0 : index
    %c0_22 = arith.constant 0 : index
    %c0_23 = arith.constant 0 : index
    %41 = vector.load %arg5[%c0_21, %c0_22, %c0_23] : memref<1x8x256xf32, #tpu.memory_space<vmem>>, vector<1x8x256xf32>
    %42 = vector.shape_cast %41 : vector<1x8x256xf32> to vector<8x256xf32>
    %43 = vector.shape_cast %40 : vector<8x256xf32> to vector<1x8x256xf32>
    tpu.vector_store %arg5[%c0_21, %c0_22, %c0_23], %43 {strides = array<i32>} : memref<1x8x256xf32, #tpu.memory_space<vmem>>, vector<1x8x256xf32>,
    return
  }
  func.func @transform_0(%arg0: i32) -> (i32, i32, i32, i32) {
    %c0_i32 = arith.constant 0 : i32
    %c0_i32_0 = arith.constant 0 : i32
    %c0_i32_1 = arith.constant 0 : i32
    %c0_i32_2 = arith.constant 0 : i32
    return %arg0, %c0_i32, %c0_i32_0, %c0_i32_1 : i32, i32, i32, i32
  }
  func.func @transform_1(%arg0: i32) -> (i32, i32) {
    %c0_i32 = arith.constant 0 : i32
    %c0_i32_0 = arith.constant 0 : i32
    %c0_i32_1 = arith.constant 0 : i32
    return %c0_i32, %c0_i32_0 : i32, i32
  }
  func.func @transform_2(%arg0: i32) -> (i32, i32) {
    %c0_i32 = arith.constant 0 : i32
    %c0_i32_0 = arith.constant 0 : i32
    %c0_i32_1 = arith.constant 0 : i32
    return %c0_i32, %c0_i32_0 : i32, i32
  }
  func.func @transform_3(%arg0: i32) -> (i32, i32) {
    %c0_i32 = arith.constant 0 : i32
    %c0_i32_0 = arith.constant 0 : i32
    %c0_i32_1 = arith.constant 0 : i32
    return %c0_i32, %c0_i32_0 : i32, i32
  }
  func.func @transform_4(%arg0: i32) -> (i32, i32, i32) {
    %c0_i32 = arith.constant 0 : i32
    %c0_i32_0 = arith.constant 0 : i32
    %c0_i32_1 = arith.constant 0 : i32
    return %arg0, %c0_i32, %c0_i32_0 : i32, i32, i32
  }
}

</mosaic_0001>

<bundles_post_ra>
// kernel: _lambda_.1
= control target key start
LH: loop header
LB: loop body
LE: loop exit
PB: predicated region body
PF: predicated region fallthrough
CT: control target
= control target key end

     0   :  { %s3983_s15 = smov 0   ;;  %s5079_s0 = inlined_call_operand.vmem [shape: bf16[2,18,16,12], index: 0, kind: input, shape index: {}]   ;;  %s5080_s1 = inlined_call_operand.vmem [shape: bf16[36,32], index: 1, kind: input, shape index: {}]   ;;  %s5081_s2 = inlined_call_operand.vmem [shape: f32[1,32], index: 2, kind: input, shape index: {}]   ;;  %s5082_s3 = inlined_call_operand.vmem [shape: f32[1,32], index: 3, kind: input, shape index: {}]   ;;  %s5083_s4 = inlined_call_operand.vmem [shape: f32[2,8,256], index: 4, kind: output, shape index: {}]  }
   0x1 LB: > { %s3343_s16 = sadd.s32 4294967295, %s3951_s15   ;;  %p3347_p0 = scmp.ge.s32.totalorder %s3951_s15, 1  ;;  %s3951_s15 = sphi %s3983_s15, %s14_s15  }
   0x2   : > { %p162_p1 = scmp.lt.s32.totalorder %s3951_s15, 3 }
   0x4   : > { %p163_p2 = pnand %p3347_p0, %p162_p1 }
   0x6   : > { %166 = sbr.rel (%p163_p2) target bundleno = 609 (0x261), region = 36 }
   0xd   : > { %v3892_v0 = vld [vmem:[%s5080_s1 + $0x4] sm:$0xfc]   ;;  %vm403_vm0 = vcmask 1045504   ;;  %p188_p3 = scmp.lt.s32.totalorder %s3343_s16, 1  ;;  %v3893_v2 = vld [vmem:[%s5080_s1] sm:$0x3f]  }
   0xe   : > { %v353_v1 = vrot.slane %v3892_v0, 2  ;;  %v3896_v3 = vld [vmem:[%s5080_s1 + $0xc] sm:$0x3f]   ;;  %3875 = vmatprep.subr.msk.bf16.mxu0 %vm403_vm0, %v3893_v2  ;;  %v702_v5 = vsel %vm403_vm0, %v3893_v2, 0  ;;  %vm354_vm1 = vcmask 97280   ;;  %vm2688_vm2 = vcmask 1041409  }
   0xf   : > { %s5255_s16 = smov (!%p188_p3, %s3343_s16), 1  ;;  %3741 = vmatpush3.bf16.msra.mxu0 %v702_v5  ;;  %v1034_v10 = vsel %vm403_vm0, %v3896_v3, 0  ;;  %vm2690_vm3 = vcmask 1043459   ;;  %vm2692_vm4 = vcmask 1045509   ;;  %vm2694_vm5 = vcmask 1047559   ;;  %s3955_s9 = smov 32  }
  0x10   : > { %3874 = vmatprep.subr.msk.bf16.mxu1 %vm403_vm0, %v353_v1  ;;  %v405_v4 = vsel %vm403_vm0, %v353_v1, 0  ;;  %s3878_s23 = smul.u32 144, %s5255_s16  ;;  %3877 = vmatprep.subr.msk.bf16.mxu0 %vm403_vm0, %v3896_v3  ;;  %s3956_s10 = smov 64   ;;  %vm3277_vm6 = vcmask 261120   ;;  %vm3279_vm7 = vcmask 523264   ;;  %vm3281_vm8 = vcmask 785408  }
  0x11   : > { %3707 = vmatpush3.bf16.msra.mxu1 %v405_v4  ;;  %s3957_s11 = smov 96   ;;  %s3654_s12 = sshll.u32 %s5255_s16, 4 }
  0x12   : > { %3876 = vmatprep.subr.msk.bf16.mxu1 %vm403_vm0, %v3893_v2  ;;  %s4012_s26 = scalar_lea.vmem %s5079_s0, %s3878_s23  ;;  %s197_s17 = scalar_lea.vmem %s5083_s4, %s3654_s12 }
  0x13   : > { %v3894_v6 = vld [vmem:[%s4012_s26 + $0x8] sm:$0xff]   ;;  %v3895_v7 = vld [vmem:[%s4012_s26] sm:$0xff]   ;;  %v3897_v8 = vld [vmem:[%s4012_s26 + $0x10] sm:$0xff]  }
  0x14   : > { %3708 = vmatprep.mubr.msk.bf16.mxu1 %vm354_vm1, %v3894_v6  ;;  %3742 = vmatprep.mubr.msk.bf16.mxu0 %vm354_vm1, %v3895_v7  ;;  %v3898_v9 = vld [vmem:[%s4012_s26 + $0x8] sm:$0xff]   ;;  %v3899_v11 = vld [vmem:[%s4012_s26 + $0x18] sm:$0xff]   ;;  %v3900_v12 = vld [vmem:[%s4012_s26 + $0x10] sm:$0xff]   ;;  %v3953_v7 = vmov 1983009808  }
  0x15   : > { %3709 = vmatmul.mubr.msk.bf16.vlgmr.msra.gmra.mrb[0].mxu1 %vm354_vm1, %v3897_v8  ;;  %3743 = vmatmul.mubr.msk.bf16.vlgmr.msra.gmra.mrb[0].mxu0 %vm354_vm1, %v3898_v9  ;;  %v3901_v13 = vld [vmem:[%s4012_s26 + $0x20] sm:$0xff]   ;;  %v3902_v14 = vld [vmem:[%s4012_s26 + $0x18] sm:$0xff]   ;;  %v3903_v15 = vld [vmem:[%s4012_s26 + $0x28] sm:$0xff]   ;;  %v1373_v8 = vunpack.c.l.s4 %v3953_v7  ;;  %v1375_v9 = vlaneseq }
  0x16   : > { %3809 = vmatpush3.bf16.msra.mxu1 %v702_v5  ;;  %3775 = vmatpush3.bf16.msra.mxu0 %v1034_v10  ;;  %v3904_v16 = vld [vmem:[%s4012_s26 + $0x20] sm:$0xff]   ;;  %v3905_v17 = vld [vmem:[%s4012_s26 + $0x30] sm:$0xff]   ;;  %v3906_v18 = vld [vmem:[%s4012_s26 + $0x28] sm:$0xff]  }
  0x17   : > { %3712 = vmatprep.mubr.msk.bf16.mxu1 %vm354_vm1, %v3899_v11  ;;  %3746 = vmatprep.mubr.msk.bf16.mxu0 %vm354_vm1, %v3900_v12  ;;  %v3907_v19 = vld [vmem:[%s4012_s26 + $0x38] sm:$0xff]   ;;  %v3908_v20 = vld [vmem:[%s4012_s26 + $0x30] sm:$0xff]   ;;  %v3909_v21 = vld [vmem:[%s4012_s26 + $0x40] sm:$0xff]  }
  0x18   : > { %v3910_v22 = vld [vmem:[%s4012_s26 + $0x38] sm:$0xff]   ;;  %v3911_v23 = vld [vmem:[%s4012_s26 + $0x48] sm:$0xff]   ;;  %v3912_v24 = vld [vmem:[%s4012_s26 + $0x10] sm:$0xff]  }
  0x19   : > { %v3913_v25 = vld [vmem:[%s4012_s26 + $0x50] sm:$0xff]   ;;  %v3914_v26 = vld [vmem:[%s4012_s26 + $0x18] sm:$0xff]   ;;  %v3916_v28 = vld [vmem:[%s4012_s26 + $0x20] sm:$0xff]  }
  0x1a   : > { %v3915_v27 = vld [vmem:[%s4012_s26 + $0x58] sm:$0xff]   ;;  %v3917_v29 = vld [vmem:[%s4012_s26 + $0x60] sm:$0xff]   ;;  %v3918_v30 = vld [vmem:[%s4012_s26 + $0x28] sm:$0xff]  }
  0x1b   : > { %v3919_v31 = vld [vmem:[%s4012_s26 + $0x68] sm:$0xff]   ;;  %v3920_v32 = vld [vmem:[%s4012_s26 + $0x30] sm:$0xff]   ;;  %v3922_v34 = vld [vmem:[%s4012_s26 + $0x38] sm:$0xff]  }
  0x1c   : > { %v3921_v33 = vld [vmem:[%s4012_s26 + $0x70] sm:$0xff]   ;;  %v3923_v35 = vld [vmem:[%s4012_s26 + $0x78] sm:$0xff]   ;;  %v3924_v36 = vld [vmem:[%s4012_s26 + $0x40] sm:$0xff]  }
  0x1d   : > { %3713 = vmatmul.mubr.msk.bf16.gmra.mrb[4].mxu1 %vm354_vm1, %v3901_v13  ;;  %3747 = vmatmul.mubr.msk.bf16.gmra.mrb[4].mxu0 %vm354_vm1, %v3902_v14  ;;  %v3925_v37 = vld [vmem:[%s4012_s26 + $0x80] sm:$0xff]   ;;  %v3926_v38 = vld [vmem:[%s4012_s26 + $0x48] sm:$0xff]   ;;  %v3928_v40 = vld [vmem:[%s4012_s26 + $0x50] sm:$0xff]   ;;  %v1374_v13 = vunpack.c.0.s8 %v1373_v8  ;;  %v4136_v14 = vshrl.u32 %v1375_v9, 7 }
  0x1e   : > { %3716 = vmatprep.mubr.msk.bf16.mxu1 %vm354_vm1, %v3903_v15  ;;  %3750 = vmatprep.mubr.msk.bf16.mxu0 %vm354_vm1, %v3904_v16  ;;  %v3927_v39 = vld [vmem:[%s4012_s26 + $0x40] sm:$0xff]   ;;  %v3929_v41 = vld [vmem:[%s4012_s26 + $0x48] sm:$0xff]   ;;  %v3930_v42 = vld [vmem:[%s4012_s26 + $0x58] sm:$0xff]  }
  0x1f   : > { %v3931_v43 = vld [vmem:[%s4012_s26 + $0x50] sm:$0xff]   ;;  %v3932_v44 = vld [vmem:[%s4012_s26 + $0x60] sm:$0xff]   ;;  %v3933_v45 = vld [vmem:[%s4012_s26 + $0x58] sm:$0xff]   ;;  %5132 = vst [vmem:[#allocation2_spill] sm:$0xff] %v4136_v14 }
  0x20   : > { %v3934_v46 = vld [vmem:[%s4012_s26 + $0x68] sm:$0xff]   ;;  %v3935_v47 = vld [vmem:[%s4012_s26 + $0x60] sm:$0xff]   ;;  %v3936_v48 = vld [vmem:[%s4012_s26 + $0x70] sm:$0xff]  }
  0x21   : > { %v3937_v49 = vld [vmem:[%s4012_s26 + $0x68] sm:$0xff]   ;;  %v3938_v50 = vld [vmem:[%s4012_s26 + $0x78] sm:$0xff]   ;;  %v3939_v51 = vld [vmem:[%s4012_s26 + $0x70] sm:$0xff]  }
  0x22   : > { %v3940_v52 = vld [vmem:[%s4012_s26 + $0x80] sm:$0xff]   ;;  %v3941_v53 = vld [vmem:[%s4012_s26 + $0x78] sm:$0xff]   ;;  %v3942_v54 = vld [vmem:[%s4012_s26 + $0x88] sm:$0xff]  }
  0x23   : > { %v4134_v11 = vld [vmem:[%s5081_s2] ss:$0 sm:$0xff] }
  0x24   : > { %v4141_v16 = vld [vmem:[%s5082_s3] ss:$0 sm:$0xff] }
  0x25   : > { %3717 = vmatmul.mubr.msk.bf16.gmra.mrb[8].mxu1 %vm354_vm1, %v3905_v17  ;;  %3751 = vmatmul.mubr.msk.bf16.gmra.mrb[8].mxu0 %vm354_vm1, %v3906_v18 }
  0x26   : > { %3720 = vmatprep.mubr.msk.bf16.mxu1 %vm354_vm1, %v3907_v19  ;;  %3754 = vmatprep.mubr.msk.bf16.mxu0 %vm354_vm1, %v3908_v20 }
  0x2d   : > { %3721 = vmatmul.mubr.msk.bf16.gmra.mrb[12].mxu1 %vm354_vm1, %v3909_v21  ;;  %3755 = vmatmul.mubr.msk.bf16.gmra.mrb[12].mxu0 %vm354_vm1, %v3910_v22 }
  0x2e   : > { %3724 = vmatprep.mubr.msk.bf16.mxu1 %vm354_vm1, %v3911_v23  ;;  %3776 = vmatprep.mubr.msk.bf16.mxu0 %vm354_vm1, %v3912_v24 }
  0x35   : > { %3725 = vmatmul.mubr.msk.bf16.gmra.mrb[16].mxu1 %vm354_vm1, %v3913_v25  ;;  %3777 = vmatmul.mubr.msk.bf16.vlgmr.msra.gmra.mrb[0].mxu0 %vm354_vm1, %v3914_v26  ;;  %v4147_v25 = vsub.s32 %v1374_v13, %v4136_v14 }
  0x36   : > { %3728 = vmatprep.mubr.msk.bf16.mxu1 %vm354_vm1, %v3915_v27  ;;  %3780 = vmatprep.mubr.msk.bf16.mxu0 %vm354_vm1, %v3916_v28 }
  0x3d   : > { %3729 = vmatmul.mubr.msk.bf16.gmra.mrb[20].mxu1 %vm354_vm1, %v3917_v29  ;;  %3781 = vmatmul.mubr.msk.bf16.gmra.mrb[4].mxu0 %vm354_vm1, %v3918_v30 }
  0x3e   : > { %3732 = vmatprep.mubr.msk.bf16.mxu1 %vm354_vm1, %v3919_v31  ;;  %3784 = vmatprep.mubr.msk.bf16.mxu0 %vm354_vm1, %v3920_v32 }
  0x45   : > { %3733 = vmatmul.mubr.msk.bf16.gmra.mrb[24].mxu1 %vm354_vm1, %v3921_v33  ;;  %3785 = vmatmul.mubr.msk.bf16.gmra.mrb[8].mxu0 %vm354_vm1, %v3922_v34 }
  0x46   : > { %3736 = vmatprep.mubr.msk.bf16.mxu1 %vm354_vm1, %v3923_v35  ;;  %3788 = vmatprep.mubr.msk.bf16.mxu0 %vm354_vm1, %v3924_v36 }
  0x4d   : > { %3737 = vmatmul.mubr.msk.bf16.gmra.mrb[28].mxu1 %vm354_vm1, %v3925_v37  ;;  %3789 = vmatmul.mubr.msk.bf16.gmra.mrb[12].mxu0 %vm354_vm1, %v3926_v38 }
  0x4e   : > { %3758 = vmatprep.mubr.msk.bf16.mxu1 %vm354_vm1, %v3927_v39  ;;  %3792 = vmatprep.mubr.msk.bf16.mxu0 %vm354_vm1, %v3928_v40 }
  0x55   : > { %3759 = vmatmul.mubr.msk.bf16.vlgmr.msra.gmra.mrb[16].mxu1 %vm354_vm1, %v3929_v41  ;;  %3793 = vmatmul.mubr.msk.bf16.gmra.mrb[16].mxu0 %vm354_vm1, %v3930_v42 }
  0x56   : > { %3762 = vmatprep.mubr.msk.bf16.mxu1 %vm354_vm1, %v3931_v43  ;;  %3796 = vmatprep.mubr.msk.bf16.mxu0 %vm354_vm1, %v3932_v44 }
  0x5d   : > { %3763 = vmatmul.mubr.msk.bf16.gmra.mrb[20].mxu1 %vm354_vm1, %v3933_v45  ;;  %3797 = vmatmul.mubr.msk.bf16.gmra.mrb[20].mxu0 %vm354_vm1, %v3934_v46 }
  0x5e   : > { %3766 = vmatprep.mubr.msk.bf16.mxu1 %vm354_vm1, %v3935_v47  ;;  %3800 = vmatprep.mubr.msk.bf16.mxu0 %vm354_vm1, %v3936_v48 }
  0x65   : > { %3767 = vmatmul.mubr.msk.bf16.gmra.mrb[24].mxu1 %vm354_vm1, %v3937_v49  ;;  %3801 = vmatmul.mubr.msk.bf16.gmra.mrb[24].mxu0 %vm354_vm1, %v3938_v50 }
  0x66   : > { %3770 = vmatprep.mubr.msk.bf16.mxu1 %vm354_vm1, %v3939_v51  ;;  %3804 = vmatprep.mubr.msk.bf16.mxu0 %vm354_vm1, %v3940_v52 }
  0x6d   : > { %3771 = vmatmul.mubr.msk.bf16.gmra.mrb[28].mxu1 %vm354_vm1, %v3941_v53  ;;  %3805 = vmatmul.mubr.msk.bf16.gmra.mrb[28].mxu0 %vm354_vm1, %v3942_v54 }
  0xe8   : > { %v3710_v55 = vpop.f32.mrb[0].mxu1 }
  0xe9   : > { %v441_v56 = vpop.f32.mrb[1].mxu1 }
  0xea   : > { %v3711_v57 = vpop.f32.mrb[2].mxu1 }
  0xeb   : > { %v444_v58 = vpop.f32.mrb[3].mxu1 }
  0xf0   : > { %v3714_v59 = vpop.f32.mrb[4].mxu1 }
  0xf1   : > { %v457_v60 = vpop.f32.mrb[5].mxu1 }
  0xf2   : > { %v4111_v61 = vpop.f32.mrb[6].mxu1 }
  0xf3   : > { %v4113_v62 = vpop.f32.mrb[7].mxu1 }
  0xf8   : > { %v4115_v63 = vpop.f32.mrb[8].mxu1 }
  0xf9   : > { %v4117_v0 = vpop.f32.mrb[9].mxu1 }
  0xfa   : > { %v4119_v1 = vpop.f32.mrb[10].mxu1 }
  0xfb   : > { %v4121_v2 = vpop.f32.mrb[11].mxu1 }
 0x100   : > { %v4123_v3 = vpop.f32.mrb[12].mxu1 }
 0x101   : > { %v4125_v4 = vpop.f32.mrb[13].mxu1 }
 0x102   : > { %v4127_v5 = vpop.f32.mrb[14].mxu1 }
 0x103   : > { %v4129_v6 = vpop.f32.mrb[15].mxu1 }
 0x108   : > { %v3778_v10 = vpop.f32.mrb[0].mxu0 }
 0x109   : > { %v3810_v12 = vadd.f32 %v3778_v10, %v3710_v55  ;;  %v1070_v15 = vpop.f32.mrb[1].mxu0 }
 0x10a   : > { %v3811_v17 = vadd.f32 %v1070_v15, %v441_v56  ;;  %v3779_v18 = vpop.f32.mrb[2].mxu0 }
 0x10b   : > { %v1238_v19 = vmul.f32 %v3810_v12, %v4134_v11  ;;  %v3812_v20 = vadd.f32 %v3779_v18, %v3711_v57  ;;  %v1073_v21 = vpop.f32.mrb[3].mxu0 }
 0x10c   : > { %v1236_v22 = vmul.f32 %v3811_v17, %v4134_v11  ;;  %v3813_v23 = vadd.f32 %v1073_v21, %v444_v58 }
 0x10d   : > { %v1277_v24 = vadd.f32 %v4141_v16, %v1238_v19  ;;  %v1239_v26 = vmul.f32 %v3812_v20, %v4134_v11 }
 0x10e   : > { %v1275_v27 = vadd.f32 %v4141_v16, %v1236_v22  ;;  %v1237_v28 = vmul.f32 %v3813_v23, %v4134_v11 }
 0x10f   : > { %v1309_v29 = vmax.f32 %v1277_v24, 0.0  ;;  %v1278_v30 = vadd.f32 %v4141_v16, %v1239_v26 }
 0x110   : > { %v1307_v31 = vmax.f32 %v1275_v27, 0.0  ;;  %v1276_v32 = vadd.f32 %v4141_v16, %v1237_v28  ;;  %v3782_v33 = vpop.f32.mrb[4].mxu0 }
 0x111   : > { %v1405_v34 = vcombine.high %v1309_v29, %v1309_v29  ;;  %v1412_v35 = vrot.slane %v1309_v29, %v4147_v25  ;;  %v1310_v36 = vmax.f32 %v1278_v30, 0.0  ;;  %v3814_v37 = vadd.f32 %v3782_v33, %v3714_v59  ;;  %v1086_v38 = vpop.f32.mrb[5].mxu0 }
 0x112   : > { %v1371_v39 = vcombine.high %v1307_v31, %v1307_v31  ;;  %v1378_v40 = vrot.slane %v1307_v31, %v4147_v25  ;;  %v1308_v41 = vmax.f32 %v1276_v32, 0.0  ;;  %v3815_v42 = vadd.f32 %v1086_v38, %v457_v60  ;;  %v3783_v43 = vpop.f32.mrb[6].mxu0 }
 0x113   : > { %v1419_v44 = vrot.slane %v1405_v34, %v4147_v25  ;;  %v1420_v45 = vcombine.high %v1412_v35, %v1412_v35  ;;  %v3524_v46 = vrot.slane %v1412_v35, 9  ;;  %v1422_v47 = vcombine.high %v1310_v36, %v1310_v36  ;;  %v1089_v48 = vpop.f32.mrb[7].mxu0 }
 0x114   : > { %v1385_v49 = vrot.slane %v1371_v39, %v4147_v25  ;;  %v1386_v50 = vcombine.high %v1378_v40, %v1378_v40  ;;  %v3516_v51 = vrot.slane %v1378_v40, 9  ;;  %v1429_v52 = vrot.slane %v1310_v36, %v4147_v25 }
 0x115   : > { %v1421_v53 = vcombine.high %v1419_v44, %v1419_v44  ;;  %v3525_v54 = vrot.slane %v1420_v45, 9  ;;  %v3526_v55 = vrot.slane %v1419_v44, 9  ;;  %v4159_v56 = vmax.f32 %v1412_v35, %v3524_v46 }
 0x116   : > { %v1387_v57 = vcombine.high %v1385_v49, %v1385_v49  ;;  %v3517_v58 = vrot.slane %v1386_v50, 9  ;;  %v3518_v59 = vrot.slane %v1385_v49, 9  ;;  %v4161_v60 = vmax.f32 %v1378_v40, %v3516_v51 }
 0x117   : > { %5133 = vst [vmem:[#allocation3_spill] sm:$0xff] %v4159_v56  ;;  %v3527_v7 = vrot.slane %v1421_v53, 9  ;;  %v2436_v8 = vmax.f32 %v1420_v45, %v3525_v54  ;;  %v4163_v9 = vmax.f32 %v1419_v44, %v3526_v55  ;;  %v1436_v10 = vrot.slane %v1422_v47, %v4147_v25 }
 0x118   : > { %5134 = vst [vmem:[#allocation4_spill] sm:$0xff] %v4161_v60  ;;  %v3519_v12 = vrot.slane %v1387_v57, 9  ;;  %v2428_v13 = vmax.f32 %v1386_v50, %v3517_v58  ;;  %v4166_v15 = vmax.f32 %v1385_v49, %v3518_v59  ;;  %v4170_v18 = vpop.f32.mrb[8].mxu0  ;;  %v1437_v20 = vcombine.high %v1429_v52, %v1429_v52 }
 0x119   : > { %5135 = vst [vmem:[#allocation5_spill] sm:$0xff] %v4163_v9  ;;  %v2438_v19 = vmax.f32 %v1421_v53, %v3527_v7  ;;  %v1438_v21 = vcombine.high %v1436_v10, %v1436_v10  ;;  %v3528_v22 = vrot.slane %v1429_v52, 9  ;;  %v4172_v23 = vpop.f32.mrb[9].mxu0  ;;  %v3530_v28 = vrot.slane %v1436_v10, 9 }
 0x11a   : > { %5136 = vst [vmem:[#allocation6_spill] sm:$0xff] %v4166_v15  ;;  %v2430_v24 = vmax.f32 %v1387_v57, %v3519_v12  ;;  %v2556_v26 = vmax.f32 %v2428_v13, %v2436_v8  ;;  %v4176_v29 = vpop.f32.mrb[10].mxu0  ;;  %v3529_v30 = vrot.slane %v1437_v20, 9  ;;  %v1388_v33 = vcombine.high %v1308_v41, %v1308_v41 }
 0x11b   : > { %v3531_v31 = vrot.slane %v1438_v21, 9  ;;  %v2439_v32 = vmax.f32 %v1429_v52, %v3528_v22  ;;  %v4178_v34 = vpop.f32.mrb[11].mxu0  ;;  %v4182_v38 = vmax.f32 %v1436_v10, %v3530_v28  ;;  %v1395_v39 = vrot.slane %v1308_v41, %v4147_v25 }
 0x11c   : > { %v2558_v35 = vmax.f32 %v2430_v24, %v2438_v19  ;;  %v4180_v36 = vrot.slane %v2556_v26, 7  ;;  %v2440_v40 = vmax.f32 %v1437_v20, %v3529_v30  ;;  %v1402_v45 = vrot.slane %v1388_v33, %v4147_v25 }
 0x11d   : > { %5138 = vst [vmem:[#allocation8_spill] sm:$0xff] %v4182_v38  ;;  %v2442_v44 = vmax.f32 %v1438_v21, %v3531_v31  ;;  %v1242_v46 = vmul.f32 %v3814_v37, %v4134_v11  ;;  %v1403_v49 = vcombine.high %v1395_v39, %v1395_v39  ;;  %v3520_v50 = vrot.slane %v1395_v39, 9 }
 0x11e   : > { %5137 = vst [vmem:[#allocation7_spill] sm:$0xff] %v4180_v36  ;;  %v4187_v47 = vrot.slane %v2558_v35, 7  ;;  %v1240_v51 = vmul.f32 %v3815_v42, %v4134_v11  ;;  %v1404_v52 = vcombine.high %v1402_v45, %v1402_v45  ;;  %v3522_v53 = vrot.slane %v1402_v45, 9 }
 0x11f   : > { %v1281_v54 = vadd.f32 %v4141_v16, %v1242_v46  ;;  %v3816_v55 = vadd.f32 %v3783_v43, %v4111_v61  ;;  %v3521_v41 = vrot.slane %v1403_v49, 9  ;;  %v2431_v57 = vmax.f32 %v1395_v39, %v3520_v50 }
 0x120   : > { %5139 = vst [vmem:[#allocation9_spill] sm:$0xff] %v4187_v47  ;;  %v1279_v58 = vadd.f32 %v4141_v16, %v1240_v51  ;;  %v3817_v59 = vadd.f32 %v1089_v48, %v4113_v62  ;;  %v4194_v37 = vpop.f32.mrb[12].mxu0  ;;  %v3523_v7 = vrot.slane %v1404_v52, 9  ;;  %v4196_v8 = vmax.f32 %v1402_v45, %v3522_v53 }
 0x121   : > { %v1313_v10 = vmax.f32 %v1281_v54, 0.0  ;;  %v1243_v42 = vmul.f32 %v3816_v55, %v4134_v11  ;;  %v4199_v12 = vpop.f32.mrb[13].mxu0  ;;  %v2432_v13 = vmax.f32 %v1403_v49, %v3521_v41  ;;  %v2559_v19 = vmax.f32 %v2431_v57, %v2439_v32 }
 0x122   : > { %5140 = vst [vmem:[#allocation10_spill] sm:$0xff] %v4196_v8  ;;  %v1311_v20 = vmax.f32 %v1279_v58, 0.0  ;;  %v1241_v61 = vmul.f32 %v3817_v59, %v4134_v11  ;;  %v4202_v43 = vpop.f32.mrb[14].mxu0  ;;  %v2434_v21 = vmax.f32 %v1404_v52, %v3523_v7 }
 0x123   : > { %v1473_v48 = vcombine.high %v1313_v10, %v1313_v10  ;;  %v1480_v22 = vrot.slane %v1313_v10, %v4147_v25  ;;  %v4207_v24 = vpop.f32.mrb[15].mxu0  ;;  %v2560_v26 = vmax.f32 %v2432_v13, %v2440_v40  ;;  %v1282_v31 = vadd.f32 %v4141_v16, %v1243_v42 }
 0x124   : > { %v1439_v28 = vcombine.high %v1311_v20, %v1311_v20  ;;  %v1446_v30 = vrot.slane %v1311_v20, %v4147_v25  ;;  %v2562_v32 = vmax.f32 %v2434_v21, %v2442_v44 }
 0x125   : > { %v1487_v33 = vrot.slane %v1473_v48, %v4147_v25  ;;  %v1488_v35 = vcombine.high %v1480_v22, %v1480_v22  ;;  %v3540_v39 = vrot.slane %v1480_v22, 9  ;;  %v4212_v45 = vrot.slane %v2560_v26, 7 }
 0x126   : > { %v1453_v46 = vrot.slane %v1439_v28, %v4147_v25  ;;  %v1454_v49 = vcombine.high %v1446_v30, %v1446_v30  ;;  %v3532_v50 = vrot.slane %v1446_v30, 9  ;;  %v4215_v51 = vrot.slane %v2562_v32, 7 }
 0x127   : > { %5141 = vst [vmem:[#allocation11_spill] sm:$0xff] %v4212_v45  ;;  %v1489_v52 = vcombine.high %v1487_v33, %v1487_v33  ;;  %v3541_v40 = vrot.slane %v1488_v35, 9  ;;  %v3542_v53 = vrot.slane %v1487_v33, 9  ;;  %v4221_v44 = vsel %vm2688_vm2, %v4212_v45, %v2559_v19 }
 0x128   : > { %5142 = vst [vmem:[#allocation12_spill] sm:$0xff] %v4215_v51  ;;  %v4217_v54 = vpop.f32.mrb[16].mxu1  ;;  %5143 = vst [vmem:[#allocation13_spill] sm:$0xff] %v4221_v44  ;;  %v4223_v55 = vmax.f32 %v1480_v22, %v3540_v39  ;;  %v1455_v41 = vcombine.high %v1453_v46, %v1453_v46  ;;  %v3533_v57 = vrot.slane %v1454_v49, 9  ;;  %v4225_v58 = vpop.f32.mrb[16].mxu0  ;;  %v3534_v13 = vrot.slane %v1453_v46, 9 }
 0x129   : > { %v4227_v59 = vpop.f32.mrb[17].mxu1  ;;  %v3543_v7 = vrot.slane %v1489_v52, 9  ;;  %v2452_v10 = vmax.f32 %v1488_v35, %v3541_v40  ;;  %v4229_v42 = vmax.f32 %v1487_v33, %v3542_v53  ;;  %v4231_v20 = vpop.f32.mrb[17].mxu0  ;;  %v4235_v19 = vmax.f32 %v1446_v30, %v3532_v50 }
 0x12a   : > { %5144 = vst [vmem:[#allocation14_spill] sm:$0xff] %v4223_v55  ;;  %v4233_v21 = vpop.f32.mrb[18].mxu1  ;;  %v3535_v48 = vrot.slane %v1455_v41, 9  ;;  %v2444_v22 = vmax.f32 %v1454_v49, %v3533_v57  ;;  %v1314_v26 = vmax.f32 %v1282_v31, 0.0  ;;  %v4237_v28 = vpop.f32.mrb[18].mxu0  ;;  %v4241_v62 = vmax.f32 %v1453_v46, %v3534_v13 }
 0x12b   : > { %5145 = vst [vmem:[#allocation15_spill] sm:$0xff] %v4229_v42  ;;  %5146 = vst [vmem:[#allocation16_spill] sm:$0xff] %v4235_v19  ;;  %v4239_v32 = vpop.f32.mrb[19].mxu1  ;;  %v2454_v39 = vmax.f32 %v1489_v52, %v3543_v7  ;;  %v1280_v33 = vadd.f32 %v4141_v16, %v1241_v61  ;;  %v3818_v35 = vadd.f32 %v4170_v18, %v4115_v63  ;;  %v4246_v40 = vpop.f32.mrb[19].mxu0 }
 0x12c   : > { %5147 = vst [vmem:[#allocation17_spill] sm:$0xff] %v4241_v62  ;;  %v2446_v53 = vmax.f32 %v1455_v41, %v3535_v48  ;;  %v2564_v49 = vmax.f32 %v2444_v22, %v2452_v10  ;;  %v1490_v31 = vcombine.high %v1314_v26, %v1314_v26  ;;  %v1497_v52 = vrot.slane %v1314_v26, %v4147_v25 }
 0x12d   : > { %v1312_v46 = vmax.f32 %v1280_v33, 0.0  ;;  %v1246_v57 = vmul.f32 %v3818_v35, %v4134_v11  ;;  %v3819_v18 = vadd.f32 %v4172_v23, %v4117_v0 }
 0x12e   : > { %v2566_v61 = vmax.f32 %v2446_v53, %v2454_v39  ;;  %v4254_v7 = vrot.slane %v2564_v49, 7  ;;  %v1504_v63 = vrot.slane %v1490_v31, %v4147_v25  ;;  %v1505_v41 = vcombine.high %v1497_v52, %v1497_v52 }
 0x12f   : > { %v3544_v13 = vrot.slane %v1497_v52, 9  ;;  %v1456_v10 = vcombine.high %v1312_v46, %v1312_v46  ;;  %v1463_v48 = vrot.slane %v1312_v46, %v4147_v25  ;;  %v1285_v39 = vadd.f32 %v4141_v16, %v1246_v57 }
 0x130   : > { %5148 = vst [vmem:[#allocation18_spill] sm:$0xff] %v4254_v7  ;;  %v4260_v22 = vpop.f32.mrb[20].mxu1  ;;  %v4262_v50 = vrot.slane %v2566_v61, 7  ;;  %v1506_v26 = vcombine.high %v1504_v63, %v1504_v63  ;;  %v3546_v33 = vrot.slane %v1504_v63, 9  ;;  %v4265_v35 = vpop.f32.mrb[20].mxu0  ;;  %v3545_v49 = vrot.slane %v1505_v41, 9 }
 0x131   : > { %v4267_v53 = vpop.f32.mrb[21].mxu1  ;;  %v2455_v31 = vmax.f32 %v1497_v52, %v3544_v13  ;;  %v1470_v0 = vrot.slane %v1456_v10, %v4147_v25  ;;  %v1471_v23 = vcombine.high %v1463_v48, %v1463_v48  ;;  %v4270_v27 = vpop.f32.mrb[21].mxu0  ;;  %v3536_v17 = vrot.slane %v1463_v48, 9 }
 0x132   : > { %5149 = vst [vmem:[#allocation19_spill] sm:$0xff] %v4262_v50  ;;  %v4272_v46 = vpop.f32.mrb[22].mxu1  ;;  %v3547_v30 = vrot.slane %v1506_v26, 9  ;;  %v4274_v61 = vmax.f32 %v1504_v63, %v3546_v33  ;;  %v1317_v51 = vmax.f32 %v1285_v39, 0.0  ;;  %v4276_v38 = vpop.f32.mrb[22].mxu0  ;;  %v2456_v8 = vmax.f32 %v1505_v41, %v3545_v49 }
 0x133   : > { %v4278_v57 = vpop.f32.mrb[23].mxu1  ;;  %v1472_v45 = vcombine.high %v1470_v0, %v1470_v0  ;;  %v3537_v44 = vrot.slane %v1471_v23, 9  ;;  %v3538_v52 = vrot.slane %v1470_v0, 9  ;;  %v4280_v13 = vpop.f32.mrb[23].mxu0  ;;  %v2447_v14 = vmax.f32 %v1463_v48, %v3536_v17 }
 0x134   : > { %5150 = vst [vmem:[#allocation20_spill] sm:$0xff] %v4274_v61  ;;  %v2458_v10 = vmax.f32 %v1506_v26, %v3547_v30  ;;  %v1541_v50 = vcombine.high %v1317_v51, %v1317_v51  ;;  %v1548_v42 = vrot.slane %v1317_v51, %v4147_v25  ;;  %v1244_v39 = vmul.f32 %v3819_v18, %v4134_v11 }
 0x135   : > { %v3539_v62 = vrot.slane %v1472_v45, 9  ;;  %v2448_v63 = vmax.f32 %v1471_v23, %v3537_v44  ;;  %v4283_v33 = vmax.f32 %v1470_v0, %v3538_v52  ;;  %v2567_v47 = vmax.f32 %v2447_v14, %v2455_v31 }
 0x136   : > { %v1555_v9 = vrot.slane %v1541_v50, %v4147_v25  ;;  %v1556_v41 = vcombine.high %v1548_v42, %v1548_v42  ;;  %v3556_v49 = vrot.slane %v1548_v42, 9  ;;  %v1283_v17 = vadd.f32 %v4141_v16, %v1244_v39 }
 0x137   : > { %5151 = vst [vmem:[#allocation21_spill] sm:$0xff] %v4283_v33  ;;  %v2450_v15 = vmax.f32 %v1472_v45, %v3539_v62  ;;  %v2568_v7 = vmax.f32 %v2448_v63, %v2456_v8  ;;  %v3820_v62 = vadd.f32 %v4176_v29, %v4119_v1 }
 0x138   : > { %v4290_v48 = vpop.f32.mrb[24].mxu1  ;;  %v1557_v51 = vcombine.high %v1555_v9, %v1555_v9  ;;  %v3557_v44 = vrot.slane %v1556_v41, 9  ;;  %v3558_v26 = vrot.slane %v1555_v9, 9  ;;  %v4292_v0 = vmax.f32 %v1548_v42, %v3556_v49  ;;  %v4294_v18 = vpop.f32.mrb[24].mxu0 }
 0x139   : > { %v4296_v14 = vpop.f32.mrb[25].mxu1  ;;  %v2570_v50 = vmax.f32 %v2450_v15, %v2458_v10  ;;  %v4298_v31 = vrot.slane %v2568_v7, 7  ;;  %v1315_v8 = vmax.f32 %v1283_v17, 0.0  ;;  %v4302_v45 = vpop.f32.mrb[25].mxu0  ;;  %v3821_v42 = vadd.f32 %v4178_v34, %v4121_v2 }
 0x13a   : > { %5152 = vst [vmem:[#allocation22_spill] sm:$0xff] %v4292_v0  ;;  %v4304_v23 = vpop.f32.mrb[26].mxu1  ;;  %v3559_v52 = vrot.slane %v1557_v51, 9  ;;  %v2468_v63 = vmax.f32 %v1556_v41, %v3557_v44  ;;  %v4306_v39 = vmax.f32 %v1555_v9, %v3558_v26  ;;  %v4310_v49 = vpop.f32.mrb[26].mxu0  ;;  %v1247_v41 = vmul.f32 %v3820_v62, %v4134_v11 }
 0x13b   : > { %5153 = vst [vmem:[#allocation23_spill] sm:$0xff] %v4298_v31  ;;  %v4312_v15 = vpop.f32.mrb[27].mxu1  ;;  %v4316_v7 = vsel %vm2688_vm2, %v4298_v31, %v2567_v47  ;;  %v4318_v1 = vrot.slane %v2570_v50, 7  ;;  %v1507_v29 = vcombine.high %v1315_v8, %v1315_v8  ;;  %v1514_v10 = vrot.slane %v1315_v8, %v4147_v25  ;;  %v4321_v17 = vpop.f32.mrb[27].mxu0 }
 0x13c   : > { %5154 = vst [vmem:[#allocation24_spill] sm:$0xff] %v4306_v39  ;;  %5155 = vst [vmem:[#allocation25_spill] sm:$0xff] %v4316_v7  ;;  %v2470_v9 = vmax.f32 %v1557_v51, %v3559_v52  ;;  %v1245_v2 = vmul.f32 %v3821_v42, %v4134_v11  ;;  %v3822_v34 = vadd.f32 %v4194_v37, %v4123_v3 }
 0x13d   : > { %5156 = vst [vmem:[#allocation26_spill] sm:$0xff] %v4318_v1  ;;  %v1521_v44 = vrot.slane %v1507_v29, %v4147_v25  ;;  %v1522_v26 = vcombine.high %v1514_v10, %v1514_v10  ;;  %v3548_v47 = vrot.slane %v1514_v10, 9  ;;  %v3823_v50 = vadd.f32 %v4199_v12, %v4125_v4 }
 0x13e   : > { %v1286_v30 = vadd.f32 %v4141_v16, %v1247_v41  ;;  %v1284_v8 = vadd.f32 %v4141_v16, %v1245_v2  ;;  %v1250_v51 = vmul.f32 %v3822_v34, %v4134_v11  ;;  %v4335_v62 = vadd.f32 %v4202_v43, %v4127_v5 }
 0x13f   : > { %v1523_v52 = vcombine.high %v1521_v44, %v1521_v44  ;;  %v3549_v42 = vrot.slane %v1522_v26, 9  ;;  %v3550_v3 = vrot.slane %v1521_v44, 9  ;;  %v4337_v37 = vmax.f32 %v1514_v10, %v3548_v47 }
 0x140   : > { %v4339_v29 = vpop.f32.mrb[28].mxu1  ;;  %v1318_v1 = vmax.f32 %v1286_v30, 0.0  ;;  %v1316_v61 = vmax.f32 %v1284_v8, 0.0  ;;  %v1289_v4 = vadd.f32 %v4141_v16, %v1250_v51  ;;  %v1248_v12 = vmul.f32 %v3823_v50, %v4134_v11  ;;  %v4343_v41 = vpop.f32.mrb[28].mxu0 }
 0x141   : > { %5157 = vst [vmem:[#allocation27_spill] sm:$0xff] %v4337_v37  ;;  %v4345_v2 = vpop.f32.mrb[29].mxu1  ;;  %v3551_v34 = vrot.slane %v1523_v52, 9  ;;  %v2460_v5 = vmax.f32 %v1522_v26, %v3549_v42  ;;  %v4347_v43 = vmax.f32 %v1521_v44, %v3550_v3  ;;  %v4351_v47 = vpop.f32.mrb[29].mxu0 }
 0x142   : > { %v4353_v33 = vpop.f32.mrb[30].mxu1  ;;  %v1558_v30 = vcombine.high %v1318_v1, %v1318_v1  ;;  %v1565_v8 = vrot.slane %v1318_v1, %v4147_v25  ;;  %v1524_v51 = vcombine.high %v1316_v61, %v1316_v61  ;;  %v1531_v50 = vrot.slane %v1316_v61, %v4147_v25  ;;  %v4357_v31 = vpop.f32.mrb[30].mxu0 }
 0x143   : > { %5158 = vst [vmem:[#allocation28_spill] sm:$0xff] %v4347_v43  ;;  %5159 = vst [vmem:[#allocation29_spill] sm:$0xff] %v4353_v33  ;;  %v4359_v7 = vpop.f32.mrb[31].mxu1  ;;  %v2462_v26 = vmax.f32 %v1523_v52, %v3551_v34  ;;  %v2572_v44 = vmax.f32 %v2460_v5, %v2468_v63  ;;  %v1321_v3 = vmax.f32 %v1289_v4, 0.0  ;;  %v4363_v10 = vpop.f32.mrb[31].mxu0 }
 0x144   : > { %5160 = vst [vmem:[#allocation30_spill] sm:$0xff] %v4357_v31  ;;  %5161 = vst [vmem:[#allocation31_spill] sm:$0xff] %v4359_v7  ;;  %v1572_v0 = vrot.slane %v1558_v30, %v4147_v25  ;;  %v1573_v37 = vcombine.high %v1565_v8, %v1565_v8  ;;  %v3560_v55 = vrot.slane %v1565_v8, 9  ;;  %v1538_v1 = vrot.slane %v1524_v51, %v4147_v25 }
 0x145   : > { %5162 = vst [vmem:[#allocation32_spill] sm:$0xff] %v4363_v10  ;;  %v2574_v19 = vmax.f32 %v2462_v26, %v2470_v9  ;;  %v4367_v61 = vrot.slane %v2572_v44, 7  ;;  %v1539_v36 = vcombine.high %v1531_v50, %v1531_v50  ;;  %v3552_v56 = vrot.slane %v1531_v50, 9 }
 0x146   : > { %v1574_v60 = vcombine.high %v1572_v0, %v1572_v0  ;;  %v3561_v52 = vrot.slane %v1573_v37, 9  ;;  %v3562_v63 = vrot.slane %v1572_v0, 9  ;;  %v2471_v34 = vmax.f32 %v1565_v8, %v3560_v55 }
 0x147   : > { %5163 = vst [vmem:[#allocation33_spill] sm:$0xff] %v4367_v61  ;;  %v4369_v5 = vrot.slane %v2574_v19, 7  ;;  %v1540_v4 = vcombine.high %v1538_v1, %v1538_v1  ;;  %v3553_v42 = vrot.slane %v1539_v36, 9  ;;  %v3554_v39 = vrot.slane %v1538_v1, 9 }
 0x148   : > { %v3563_v43 = vrot.slane %v1574_v60, 9  ;;  %v2472_v30 = vmax.f32 %v1573_v37, %v3561_v52  ;;  %v4371_v10 = vmax.f32 %v1572_v0, %v3562_v63  ;;  %v2463_v7 = vmax.f32 %v1531_v50, %v3552_v56 }
 0x149   : > { %5164 = vst [vmem:[#allocation34_spill] sm:$0xff] %v4369_v5  ;;  %v3555_v51 = vrot.slane %v1540_v4, 9  ;;  %v2464_v9 = vmax.f32 %v1539_v36, %v3553_v42  ;;  %v4373_v26 = vmax.f32 %v1538_v1, %v3554_v39  ;;  %v1609_v44 = vcombine.high %v1321_v3, %v1321_v3 }
 0x14a   : > { %5165 = vst [vmem:[#allocation35_spill] sm:$0xff] %v4371_v10  ;;  %v2474_v61 = vmax.f32 %v1574_v60, %v3563_v43  ;;  %v2575_v31 = vmax.f32 %v2463_v7, %v2471_v34  ;;  %v1616_v33 = vrot.slane %v1321_v3, %v4147_v25  ;;  %v1287_v55 = vadd.f32 %v4141_v16, %v1248_v12 }
 0x14b   : > { %5166 = vst [vmem:[#allocation36_spill] sm:$0xff] %v4373_v26  ;;  %v2466_v19 = vmax.f32 %v1540_v4, %v3555_v51  ;;  %v2576_v8 = vmax.f32 %v2464_v9, %v2472_v30  ;;  %v1623_v0 = vrot.slane %v1609_v44, %v4147_v25  ;;  %v1251_v36 = vmul.f32 %v4335_v62, %v4134_v11 }
 0x14c   : > { %v1624_v37 = vcombine.high %v1616_v33, %v1616_v33  ;;  %v3572_v56 = vrot.slane %v1616_v33, 9  ;;  %v1319_v50 = vmax.f32 %v1287_v55, 0.0  ;;  %v3825_v44 = vadd.f32 %v4207_v24, %v4129_v6 }
 0x14d   : > { %v2578_v39 = vmax.f32 %v2466_v19, %v2474_v61  ;;  %v4382_v60 = vrot.slane %v2576_v8, 7  ;;  %v1625_v7 = vcombine.high %v1623_v0, %v1623_v0  ;;  %v3574_v43 = vrot.slane %v1623_v0, 9 }
 0x14e   : > { %v3573_v42 = vrot.slane %v1624_v37, 9  ;;  %v4384_v12 = vmax.f32 %v1616_v33, %v3572_v56  ;;  %v1575_v3 = vcombine.high %v1319_v50, %v1319_v50  ;;  %v1582_v1 = vrot.slane %v1319_v50, %v4147_v25 }
 0x14f   : > { %5167 = vst [vmem:[#allocation37_spill] sm:$0xff] %v4382_v60  ;;  %v4389_v52 = vsel %vm2688_vm2, %v4382_v60, %v2575_v31  ;;  %v4391_v63 = vrot.slane %v2578_v39, 7  ;;  %v3575_v34 = vrot.slane %v1625_v7, 9  ;;  %v4393_v4 = vmax.f32 %v1623_v0, %v3574_v43 }
 0x150   : > { %5168 = vst [vmem:[#allocation38_spill] sm:$0xff] %v4389_v52  ;;  %v2484_v62 = vmax.f32 %v1624_v37, %v3573_v42  ;;  %v1589_v61 = vrot.slane %v1575_v3, %v4147_v25  ;;  %v1590_v30 = vcombine.high %v1582_v1, %v1582_v1  ;;  %v3564_v51 = vrot.slane %v1582_v1, 9 }
 0x151   : > { %5169 = vst [vmem:[#allocation39_spill] sm:$0xff] %v4391_v63  ;;  %v2486_v9 = vmax.f32 %v1625_v7, %v3575_v34  ;;  %v1290_v33 = vadd.f32 %v4141_v16, %v1251_v36  ;;  %v3826_v31 = vadd.f32 %v4225_v58, %v4217_v54  ;;  %v1249_v37 = vmul.f32 %v3825_v44, %v4134_v11 }
 0x152   : > { %v1591_v55 = vcombine.high %v1589_v61, %v1589_v61  ;;  %v3565_v19 = vrot.slane %v1590_v30, 9  ;;  %v3566_v8 = vrot.slane %v1589_v61, 9  ;;  %v4401_v56 = vmax.f32 %v1582_v1, %v3564_v51 }
 0x153   : > { %v1322_v0 = vmax.f32 %v1290_v33, 0.0  ;;  %v1254_v50 = vmul.f32 %v3826_v31, %v4134_v11  ;;  %v3827_v39 = vadd.f32 %v4231_v20, %v4227_v59  ;;  %v1288_v58 = vadd.f32 %v4141_v16, %v1249_v37 }
 0x154   : > { %v3567_v36 = vrot.slane %v1591_v55, 9  ;;  %v2476_v7 = vmax.f32 %v1590_v30, %v3565_v19  ;;  %v4407_v43 = vmax.f32 %v1589_v61, %v3566_v8 }
 0x155   : > { %v1626_v24 = vcombine.high %v1322_v0, %v1322_v0  ;;  %v1633_v54 = vrot.slane %v1322_v0, %v4147_v25  ;;  %v1293_v42 = vadd.f32 %v4141_v16, %v1254_v50  ;;  %v1252_v59 = vmul.f32 %v3827_v39, %v4134_v11 }
 0x156   : > { %v2478_v3 = vmax.f32 %v1591_v55, %v3567_v36  ;;  %v2580_v1 = vmax.f32 %v2476_v7, %v2484_v62  ;;  %v1320_v51 = vmax.f32 %v1288_v58, 0.0 }
 0x157   : > { %v1640_v20 = vrot.slane %v1626_v24, %v4147_v25  ;;  %v1641_v61 = vcombine.high %v1633_v54, %v1633_v54  ;;  %v3576_v30 = vrot.slane %v1633_v54, 9  ;;  %v1325_v31 = vmax.f32 %v1293_v42, 0.0 }
 0x158   : > { %v2582_v33 = vmax.f32 %v2478_v3, %v2486_v9  ;;  %v4418_v44 = vrot.slane %v2580_v1, 7  ;;  %v1291_v19 = vadd.f32 %v4141_v16, %v1252_v59  ;;  %v1592_v50 = vcombine.high %v1320_v51, %v1320_v51 }
 0x159   : > { %v1642_v8 = vcombine.high %v1640_v20, %v1640_v20  ;;  %v3577_v0 = vrot.slane %v1641_v61, 9  ;;  %v3578_v55 = vrot.slane %v1640_v20, 9  ;;  %v2487_v62 = vmax.f32 %v1633_v54, %v3576_v30 }
 0x15a   : > { %v4421_v37 = vrot.slane %v2582_v33, 7  ;;  %v1599_v39 = vrot.slane %v1320_v51, %v4147_v25  ;;  %v1677_v36 = vcombine.high %v1325_v31, %v1325_v31  ;;  %v1684_v9 = vrot.slane %v1325_v31, %v4147_v25 }
 0x15b   : > { %v3579_v7 = vrot.slane %v1642_v8, 9  ;;  %v2488_v24 = vmax.f32 %v1641_v61, %v3577_v0  ;;  %v4424_v5 = vmax.f32 %v1640_v20, %v3578_v55  ;;  %v1606_v58 = vrot.slane %v1592_v50, %v4147_v25 }
 0x15c   : > { %5170 = vst [vmem:[#allocation40_spill] sm:$0xff] %v4421_v37  ;;  %v1607_v42 = vcombine.high %v1599_v39, %v1599_v39  ;;  %v3568_v3 = vrot.slane %v1599_v39, 9  ;;  %v1691_v1 = vrot.slane %v1677_v36, %v4147_v25  ;;  %v1692_v54 = vcombine.high %v1684_v9, %v1684_v9 }
 0x15d   : > { %5171 = vst [vmem:[#allocation41_spill] sm:$0xff] %v4424_v5  ;;  %v2490_v59 = vmax.f32 %v1642_v8, %v3579_v7  ;;  %v3588_v30 = vrot.slane %v1684_v9, 9  ;;  %v1323_v33 = vmax.f32 %v1291_v19, 0.0  ;;  %v1608_v34 = vcombine.high %v1606_v58, %v1606_v58 }
 0x15e   : > { %v3569_v6 = vrot.slane %v1607_v42, 9  ;;  %v3570_v51 = vrot.slane %v1606_v58, 9  ;;  %v2479_v63 = vmax.f32 %v1599_v39, %v3568_v3  ;;  %v1693_v10 = vcombine.high %v1691_v1, %v1691_v1 }
 0x15f   : > { %v3589_v61 = vrot.slane %v1692_v54, 9  ;;  %v3590_v20 = vrot.slane %v1691_v1, 9  ;;  %v4429_v0 = vmax.f32 %v1684_v9, %v3588_v30  ;;  %v3571_v31 = vrot.slane %v1608_v34, 9 }
 0x160   : > { %v2480_v55 = vmax.f32 %v1607_v42, %v3569_v6  ;;  %v4431_v50 = vmax.f32 %v1606_v58, %v3570_v51  ;;  %v2583_v26 = vmax.f32 %v2479_v63, %v2487_v62  ;;  %v3591_v60 = vrot.slane %v1693_v10, 9 }
 0x161   : > { %v2500_v36 = vmax.f32 %v1692_v54, %v3589_v61  ;;  %v4433_v8 = vmax.f32 %v1691_v1, %v3590_v20  ;;  %v1643_v7 = vcombine.high %v1323_v33, %v1323_v33  ;;  %v2482_v19 = vmax.f32 %v1608_v34, %v3571_v31 }
 0x162   : > { %5172 = vst [vmem:[#allocation42_spill] sm:$0xff] %v4431_v50  ;;  %v2584_v52 = vmax.f32 %v2480_v55, %v2488_v24  ;;  %v1650_v3 = vrot.slane %v1323_v33, %v4147_v25  ;;  %v2502_v37 = vmax.f32 %v1693_v10, %v3591_v60  ;;  %v3828_v6 = vadd.f32 %v4237_v28, %v4233_v21 }
 0x163   : > { %v1657_v9 = vrot.slane %v1643_v7, %v4147_v25  ;;  %v3829_v63 = vadd.f32 %v4246_v40, %v4239_v32  ;;  %v2586_v62 = vmax.f32 %v2482_v19, %v2490_v59  ;;  %v3831_v61 = vadd.f32 %v4270_v27, %v4267_v53 }
 0x164   : > { %v4443_v58 = vrot.slane %v2584_v52, 7  ;;  %v1658_v42 = vcombine.high %v1650_v3, %v1650_v3  ;;  %v3580_v34 = vrot.slane %v1650_v3, 9  ;;  %v1255_v54 = vmul.f32 %v3828_v6, %v4134_v11 }
 0x165   : > { %v1659_v24 = vcombine.high %v1657_v9, %v1657_v9  ;;  %v3582_v1 = vrot.slane %v1657_v9, 9  ;;  %v1253_v30 = vmul.f32 %v3829_v63, %v4134_v11  ;;  %v4451_v60 = vrot.slane %v2586_v62, 7 }
 0x166   : > { %v4449_v10 = vsel %vm2688_vm2, %v4443_v58, %v2583_v26  ;;  %v3581_v21 = vrot.slane %v1658_v42, 9  ;;  %v4453_v28 = vmax.f32 %v1650_v3, %v3580_v34  ;;  %v1294_v52 = vadd.f32 %v4141_v16, %v1255_v54 }
 0x167   : > { %5173 = vst [vmem:[#allocation43_spill] sm:$0xff] %v4451_v60  ;;  %v3583_v32 = vrot.slane %v1659_v24, 9  ;;  %v4455_v40 = vmax.f32 %v1657_v9, %v3582_v1  ;;  %v1292_v59 = vadd.f32 %v4141_v16, %v1253_v30  ;;  %v3830_v26 = vadd.f32 %v4265_v35, %v4260_v22 }
 0x168   : > { %v2492_v33 = vmax.f32 %v1658_v42, %v3581_v21  ;;  %v1326_v55 = vmax.f32 %v1294_v52, 0.0  ;;  %v1256_v9 = vmul.f32 %v3831_v61, %v4134_v11  ;;  %v3832_v6 = vadd.f32 %v4276_v38, %v4272_v46 }
 0x169   : > { %v2494_v20 = vmax.f32 %v1659_v24, %v3583_v32  ;;  %v1324_v7 = vmax.f32 %v1292_v59, 0.0  ;;  %v1258_v3 = vmul.f32 %v3830_v26, %v4134_v11 }
 0x16a   : > { %v2588_v19 = vmax.f32 %v2492_v33, %v2500_v36  ;;  %v1694_v62 = vcombine.high %v1326_v55, %v1326_v55  ;;  %v1701_v22 = vrot.slane %v1326_v55, %v4147_v25  ;;  %v1295_v36 = vadd.f32 %v4141_v16, %v1256_v9 }
 0x16b   : > { %v2590_v63 = vmax.f32 %v2494_v20, %v2502_v37  ;;  %v1660_v35 = vcombine.high %v1324_v7, %v1324_v7  ;;  %v1667_v53 = vrot.slane %v1324_v7, %v4147_v25  ;;  %v1297_v42 = vadd.f32 %v4141_v16, %v1258_v3 }
 0x16c   : > { %v4472_v27 = vrot.slane %v2588_v19, 7  ;;  %v1708_v24 = vrot.slane %v1694_v62, %v4147_v25  ;;  %v1709_v1 = vcombine.high %v1701_v22, %v1701_v22  ;;  %v3592_v54 = vrot.slane %v1701_v22, 9 }
 0x16d   : > { %v4477_v34 = vrot.slane %v2590_v63, 7  ;;  %v1674_v38 = vrot.slane %v1660_v35, %v4147_v25  ;;  %v1675_v46 = vcombine.high %v1667_v53, %v1667_v53  ;;  %v3584_v37 = vrot.slane %v1667_v53, 9 }
 0x16e   : > { %v1329_v30 = vmax.f32 %v1297_v42, 0.0  ;;  %v1710_v21 = vcombine.high %v1708_v24, %v1708_v24  ;;  %v3593_v32 = vrot.slane %v1709_v1, 9  ;;  %v3594_v52 = vrot.slane %v1708_v24, 9 }
 0x16f   : > { %v2503_v59 = vmax.f32 %v1701_v22, %v3592_v54  ;;  %v1676_v33 = vcombine.high %v1674_v38, %v1674_v38  ;;  %v3585_v26 = vrot.slane %v1675_v46, 9  ;;  %v3586_v61 = vrot.slane %v1674_v38, 9 }
 0x170   : > { %v2495_v20 = vmax.f32 %v1667_v53, %v3584_v37  ;;  %v3595_v55 = vrot.slane %v1710_v21, 9  ;;  %v2504_v7 = vmax.f32 %v1709_v1, %v3593_v32  ;;  %v4481_v19 = vmax.f32 %v1708_v24, %v3594_v52 }
 0x171   : > { %v1745_v3 = vcombine.high %v1329_v30, %v1329_v30  ;;  %v3587_v9 = vrot.slane %v1676_v33, 9  ;;  %v2496_v63 = vmax.f32 %v1675_v46, %v3585_v26  ;;  %v4483_v62 = vmax.f32 %v1674_v38, %v3586_v61 }
 0x172   : > { %5174 = vst [vmem:[#allocation44_spill] sm:$0xff] %v4481_v19  ;;  %v2591_v35 = vmax.f32 %v2495_v20, %v2503_v59  ;;  %v2506_v39 = vmax.f32 %v1710_v21, %v3595_v55  ;;  %v1752_v42 = vrot.slane %v1329_v30, %v4147_v25  ;;  %v1327_v22 = vmax.f32 %v1295_v36, 0.0 }
 0x173   : > { %5175 = vst [vmem:[#allocation45_spill] sm:$0xff] %v4483_v62  ;;  %v1759_v31 = vrot.slane %v1745_v3, %v4147_v25  ;;  %v2498_v54 = vmax.f32 %v1676_v33, %v3587_v9  ;;  %v2592_v51 = vmax.f32 %v2496_v63, %v2504_v7  ;;  %v1259_v24 = vmul.f32 %v3832_v6, %v4134_v11 }
 0x174   : > { %v1760_v1 = vcombine.high %v1752_v42, %v1752_v42  ;;  %v3604_v32 = vrot.slane %v1752_v42, 9  ;;  %v1711_v21 = vcombine.high %v1327_v22, %v1327_v22  ;;  %v1718_v30 = vrot.slane %v1327_v22, %v4147_v25 }
 0x175   : > { %v1761_v37 = vcombine.high %v1759_v31, %v1759_v31  ;;  %v3606_v46 = vrot.slane %v1759_v31, 9  ;;  %v2594_v38 = vmax.f32 %v2498_v54, %v2506_v39  ;;  %v4490_v52 = vrot.slane %v2592_v51, 7 }
 0x176   : > { %v3605_v59 = vrot.slane %v1760_v1, 9  ;;  %v4493_v36 = vmax.f32 %v1752_v42, %v3604_v32  ;;  %v1725_v20 = vrot.slane %v1711_v21, %v4147_v25  ;;  %v1726_v39 = vcombine.high %v1718_v30, %v1718_v30 }
 0x177   : > { %5176 = vst [vmem:[#allocation46_spill] sm:$0xff] %v4490_v52  ;;  %v3607_v26 = vrot.slane %v1761_v37, 9  ;;  %v4495_v33 = vmax.f32 %v1759_v31, %v3606_v46  ;;  %v4499_v61 = vsel %vm2688_vm2, %v4490_v52, %v2591_v35  ;;  %v4501_v6 = vrot.slane %v2594_v38, 7 }
 0x178   : > { %v2516_v51 = vmax.f32 %v1760_v1, %v3605_v59  ;;  %v3596_v7 = vrot.slane %v1718_v30, 9  ;;  %v1298_v3 = vadd.f32 %v4141_v16, %v1259_v24  ;;  %v1727_v9 = vcombine.high %v1725_v20, %v1725_v20 }
 0x179   : > { %5177 = vst [vmem:[#allocation47_spill] sm:$0xff] %v4501_v6  ;;  %v2518_v55 = vmax.f32 %v1761_v37, %v3607_v26  ;;  %v3597_v63 = vrot.slane %v1726_v39, 9  ;;  %v3598_v42 = vrot.slane %v1725_v20, 9  ;;  %v3833_v31 = vadd.f32 %v4280_v13, %v4278_v57 }
 0x17a   : > { %v4507_v22 = vmax.f32 %v1718_v30, %v3596_v7  ;;  %v1330_v35 = vmax.f32 %v1298_v3, 0.0  ;;  %v3834_v54 = vadd.f32 %v4294_v18, %v4290_v48  ;;  %v3835_v32 = vadd.f32 %v4302_v45, %v4296_v14 }
 0x17b   : > { %v3599_v1 = vrot.slane %v1727_v9, 9  ;;  %v2508_v37 = vmax.f32 %v1726_v39, %v3597_v63  ;;  %v4513_v46 = vmax.f32 %v1725_v20, %v3598_v42  ;;  %v1257_v24 = vmul.f32 %v3833_v31, %v4134_v11 }
 0x17c   : > { %v1762_v21 = vcombine.high %v1330_v35, %v1330_v35  ;;  %v1769_v57 = vrot.slane %v1330_v35, %v4147_v25  ;;  %v1262_v13 = vmul.f32 %v3834_v54, %v4134_v11  ;;  %v4530_v11 = vld [vmem:[%s5081_s2] ss:$0 sm:$0xff] }
 0x17d   : > { %v2510_v30 = vmax.f32 %v1727_v9, %v3599_v1  ;;  %v2596_v59 = vmax.f32 %v2508_v37, %v2516_v51  ;;  %v1296_v18 = vadd.f32 %v4141_v16, %v1257_v24  ;;  %v1260_v51 = vmul.f32 %v4530_v11, %v3835_v32 }
 0x17e   : > { %v1776_v14 = vrot.slane %v1762_v21, %v4147_v25  ;;  %v1777_v45 = vcombine.high %v1769_v57, %v1769_v57  ;;  %v3608_v26 = vrot.slane %v1769_v57, 9  ;;  %v1301_v20 = vadd.f32 %v4141_v16, %v1262_v13  ;;  %v4541_v21 = vld [vmem:[%s5082_s3] ss:$0 sm:$0xff] }
 0x17f   : > { %v2598_v39 = vmax.f32 %v2510_v30, %v2518_v55  ;;  %v4525_v7 = vrot.slane %v2596_v59, 7  ;;  %v1328_v3 = vmax.f32 %v1296_v18, 0.0  ;;  %v1299_v32 = vadd.f32 %v4541_v21, %v1260_v51 }
 0x180   : > { %v1778_v9 = vcombine.high %v1776_v14, %v1776_v14  ;;  %v3609_v63 = vrot.slane %v1777_v45, 9  ;;  %v3610_v42 = vrot.slane %v1776_v14, 9  ;;  %v2519_v31 = vmax.f32 %v1769_v57, %v3608_v26 }
 0x181   : > { %v4533_v35 = vrot.slane %v2598_v39, 7  ;;  %v1728_v54 = vcombine.high %v1328_v3, %v1328_v3  ;;  %v1735_v16 = vrot.slane %v1328_v3, %v4147_v25  ;;  %v1333_v55 = vmax.f32 %v1301_v20, 0.0 }
 0x182   : > { %v3611_v1 = vrot.slane %v1778_v9, 9  ;;  %v2520_v37 = vmax.f32 %v1777_v45, %v3609_v63  ;;  %v4536_v24 = vmax.f32 %v1776_v14, %v3610_v42  ;;  %v1331_v20 = vmax.f32 %v1299_v32, 0.0 }
 0x183   : > { %v1742_v13 = vrot.slane %v1728_v54, %v4147_v25  ;;  %v1743_v57 = vcombine.high %v1735_v16, %v1735_v16  ;;  %v3600_v30 = vrot.slane %v1735_v16, 9  ;;  %v1813_v59 = vcombine.high %v1333_v55, %v1333_v55 }
 0x184   : > { %5178 = vst [vmem:[#allocation48_spill] sm:$0xff] %v4536_v24  ;;  %v2522_v18 = vmax.f32 %v1778_v9, %v3611_v1  ;;  %v1820_v26 = vrot.slane %v1333_v55, %v4147_v25  ;;  %v3836_v14 = vadd.f32 %v4310_v49, %v4304_v23  ;;  %v1779_v48 = vcombine.high %v1331_v20, %v1331_v20 }
 0x185   : > { %v1744_v45 = vcombine.high %v1742_v13, %v1742_v13  ;;  %v3601_v39 = vrot.slane %v1743_v57, 9  ;;  %v3602_v3 = vrot.slane %v1742_v13, 9  ;;  %v2511_v63 = vmax.f32 %v1735_v16, %v3600_v30 }
 0x186   : > { %v1827_v42 = vrot.slane %v1813_v59, %v4147_v25  ;;  %v1828_v53 = vcombine.high %v1820_v26, %v1820_v26  ;;  %v3620_v51 = vrot.slane %v1820_v26, 9  ;;  %v1786_v30 = vrot.slane %v1331_v20, %v4147_v25 }
 0x187   : > { %v3603_v54 = vrot.slane %v1744_v45, 9  ;;  %v2512_v38 = vmax.f32 %v1743_v57, %v3601_v39  ;;  %v4549_v6 = vmax.f32 %v1742_v13, %v3602_v3  ;;  %v2599_v9 = vmax.f32 %v2511_v63, %v2519_v31 }
 0x188   : > { %v1829_v1 = vcombine.high %v1827_v42, %v1827_v42  ;;  %v3621_v55 = vrot.slane %v1828_v53, 9  ;;  %v3622_v32 = vrot.slane %v1827_v42, 9  ;;  %v4551_v19 = vmax.f32 %v1820_v26, %v3620_v51 }
 0x189   : > { %5179 = vst [vmem:[#allocation49_spill] sm:$0xff] %v4549_v6  ;;  %v2514_v23 = vmax.f32 %v1744_v45, %v3603_v54  ;;  %v2600_v49 = vmax.f32 %v2512_v38, %v2520_v37  ;;  %v1793_v13 = vrot.slane %v1779_v48, %v4147_v25  ;;  %v1794_v39 = vcombine.high %v1786_v30, %v1786_v30 }
 0x18a   : > { %v3623_v59 = vrot.slane %v1829_v1, 9  ;;  %v2532_v62 = vmax.f32 %v1828_v53, %v3621_v55  ;;  %v4556_v60 = vmax.f32 %v1827_v42, %v3622_v32  ;;  %v3612_v3 = vrot.slane %v1786_v30, 9 }
 0x18b   : > { %v2602_v57 = vmax.f32 %v2514_v23, %v2522_v18  ;;  %v4559_v31 = vrot.slane %v2600_v49, 7  ;;  %v1795_v63 = vcombine.high %v1793_v13, %v1793_v13  ;;  %v3614_v45 = vrot.slane %v1793_v13, 9 }
 0x18c   : > { %v2534_v26 = vmax.f32 %v1829_v1, %v3623_v59  ;;  %v1263_v38 = vmul.f32 %v4530_v11, %v3836_v14  ;;  %v3613_v53 = vrot.slane %v1794_v39, 9  ;;  %v4568_v42 = vmax.f32 %v1786_v30, %v3612_v3 }
 0x18d   : > { %5180 = vst [vmem:[#allocation50_spill] sm:$0xff] %v4559_v31  ;;  %v4564_v37 = vsel %vm2688_vm2, %v4559_v31, %v2599_v9  ;;  %v4566_v20 = vrot.slane %v2602_v57, 7  ;;  %v3615_v48 = vrot.slane %v1795_v63, 9  ;;  %v4570_v18 = vmax.f32 %v1793_v13, %v3614_v45  ;;  %v5183_v13 = vld [vmem:[#allocation29_spill] sm:$0xff]  ;;  %v5184_v57 = vld [vmem:[#allocation30_spill] sm:$0xff] }
 0x18e   : > { %5181 = vst [vmem:[#allocation51_spill] sm:$0xff] %v4564_v37  ;;  %v1302_v51 = vadd.f32 %v4541_v21, %v1263_v38  ;;  %v3837_v54 = vadd.f32 %v4321_v17, %v4312_v15  ;;  %v2524_v1 = vmax.f32 %v1794_v39, %v3613_v53  ;;  %v3838_v9 = vadd.f32 %v4343_v41, %v4339_v29 }
 0x18f   : > { %5182 = vst [vmem:[#allocation52_spill] sm:$0xff] %v4566_v20  ;;  %v3839_v55 = vadd.f32 %v4351_v47, %v4345_v2  ;;  %v2526_v32 = vmax.f32 %v1795_v63, %v3615_v48  ;;  %v3840_v39 = vadd.f32 %v5184_v57, %v5183_v13 }
 0x190   : > { %v1334_v49 = vmax.f32 %v1302_v51, 0.0  ;;  %v1261_v30 = vmul.f32 %v4530_v11, %v3837_v54  ;;  %v2604_v59 = vmax.f32 %v2524_v1, %v2532_v62  ;;  %v1266_v15 = vmul.f32 %v4530_v11, %v3838_v9 }
 0x191   : > { %v1264_v17 = vmul.f32 %v4530_v11, %v3839_v55  ;;  %v2606_v3 = vmax.f32 %v2526_v32, %v2534_v26  ;;  %v1267_v62 = vmul.f32 %v4530_v11, %v3840_v39 }
 0x192   : > { %v1830_v29 = vcombine.high %v1334_v49, %v1334_v49  ;;  %v1837_v41 = vrot.slane %v1334_v49, %v4147_v25  ;;  %v1300_v2 = vadd.f32 %v4541_v21, %v1261_v30  ;;  %v4590_v47 = vrot.slane %v2604_v59, 7 }
 0x193   : > { %v1305_v63 = vadd.f32 %v4541_v21, %v1266_v15  ;;  %v1303_v45 = vadd.f32 %v4541_v21, %v1264_v17  ;;  %v4595_v38 = vrot.slane %v2606_v3, 7  ;;  %v1306_v9 = vadd.f32 %v4541_v21, %v1267_v62 }
 0x194   : > { %v1844_v53 = vrot.slane %v1830_v29, %v4147_v25  ;;  %v1845_v48 = vcombine.high %v1837_v41, %v1837_v41  ;;  %v3624_v51 = vrot.slane %v1837_v41, 9  ;;  %v1332_v26 = vmax.f32 %v1300_v2, 0.0 }
 0x195   : > { %v1337_v54 = vmax.f32 %v1305_v63, 0.0  ;;  %v1335_v1 = vmax.f32 %v1303_v45, 0.0 }
 0x196   : > { %v1846_v55 = vcombine.high %v1844_v53, %v1844_v53  ;;  %v3625_v32 = vrot.slane %v1845_v48, 9  ;;  %v3626_v49 = vrot.slane %v1844_v53, 9  ;;  %v2535_v30 = vmax.f32 %v1837_v41, %v3624_v51 }
 0x197   : > { %v1796_v59 = vcombine.high %v1332_v26, %v1332_v26  ;;  %v1803_v15 = vrot.slane %v1332_v26, %v4147_v25  ;;  %v1881_v17 = vcombine.high %v1337_v54, %v1337_v54  ;;  %v1888_v13 = vrot.slane %v1337_v54, %v4147_v25 }
 0x198   : > { %v3627_v57 = vrot.slane %v1846_v55, 9  ;;  %v2536_v39 = vmax.f32 %v1845_v48, %v3625_v32  ;;  %v4601_v3 = vmax.f32 %v1844_v53, %v3626_v49  ;;  %v1847_v29 = vcombine.high %v1335_v1, %v1335_v1 }
 0x199   : > { %v1810_v2 = vrot.slane %v1796_v59, %v4147_v25  ;;  %v1811_v63 = vcombine.high %v1803_v15, %v1803_v15  ;;  %v3616_v45 = vrot.slane %v1803_v15, 9  ;;  %v1895_v62 = vrot.slane %v1881_v17, %v4147_v25 }
 0x19a   : > { %v2538_v16 = vmax.f32 %v1846_v55, %v3627_v57  ;;  %v1896_v23 = vcombine.high %v1888_v13, %v1888_v13  ;;  %v3636_v41 = vrot.slane %v1888_v13, 9  ;;  %v1854_v51 = vrot.slane %v1335_v1, %v4147_v25 }
 0x19b   : > { %v1812_v26 = vcombine.high %v1810_v2, %v1810_v2  ;;  %v3617_v14 = vrot.slane %v1811_v63, 9  ;;  %v3618_v20 = vrot.slane %v1810_v2, 9  ;;  %v2527_v54 = vmax.f32 %v1803_v15, %v3616_v45 }
 0x19c   : > { %v1897_v24 = vcombine.high %v1895_v62, %v1895_v62  ;;  %v3637_v48 = vrot.slane %v1896_v23, 9  ;;  %v3638_v53 = vrot.slane %v1895_v62, 9  ;;  %v4606_v32 = vmax.f32 %v1888_v13, %v3636_v41 }
 0x19d   : > { %v3619_v49 = vrot.slane %v1812_v26, 9  ;;  %v2528_v59 = vmax.f32 %v1811_v63, %v3617_v14  ;;  %v4608_v6 = vmax.f32 %v1810_v2, %v3618_v20  ;;  %v2607_v5 = vmax.f32 %v2527_v54, %v2535_v30 }
 0x19e   : > { %v3639_v17 = vrot.slane %v1897_v24, 9  ;;  %v2548_v55 = vmax.f32 %v1896_v23, %v3637_v48  ;;  %v4610_v57 = vmax.f32 %v1895_v62, %v3638_v53  ;;  %v1861_v1 = vrot.slane %v1847_v29, %v4147_v25  ;;  %v5185_v29 = vld [vmem:[#allocation31_spill] sm:$0xff] }
 0x19f   : > { %v2530_v50 = vmax.f32 %v1812_v26, %v3619_v49  ;;  %v2608_v31 = vmax.f32 %v2528_v59, %v2536_v39  ;;  %v2609_v15 = vmax.f32 %v4608_v6, %v4601_v3  ;;  %v1862_v45 = vcombine.high %v1854_v51, %v1854_v51  ;;  %v5186_v39 = vld [vmem:[#allocation32_spill] sm:$0xff]  ;;  %v5188_v59 = vld [vmem:[#allocation3_spill] sm:$0xff] }
 0x1a0   : > { %v2550_v37 = vmax.f32 %v1897_v24, %v3639_v17  ;;  %v1863_v13 = vcombine.high %v1861_v1, %v1861_v1  ;;  %v3628_v41 = vrot.slane %v1854_v51, 9  ;;  %v3630_v52 = vrot.slane %v1861_v1, 9 }
 0x1a1   : > { %v2610_v14 = vmax.f32 %v2530_v50, %v2538_v16  ;;  %v4615_v20 = vrot.slane %v2608_v31, 7  ;;  %v3629_v30 = vrot.slane %v1862_v45, 9  ;;  %v1338_v2 = vmax.f32 %v1306_v9, 0.0 }
 0x1a2   : > { %v3631_v23 = vrot.slane %v1863_v13, 9  ;;  %v4617_v63 = vmax.f32 %v1854_v51, %v3628_v41  ;;  %v4619_v62 = vmax.f32 %v1861_v1, %v3630_v52  ;;  %v3841_v26 = vadd.f32 %v5186_v39, %v5185_v29  ;;  %v5190_v1 = vld [vmem:[#allocation7_spill] sm:$0xff] }
 0x1a3   : > { %v4625_v54 = vsel %vm2688_vm2, %v4615_v20, %v2607_v5  ;;  %v4627_v24 = vrot.slane %v2610_v14, 7  ;;  %v2540_v48 = vmax.f32 %v1862_v45, %v3629_v30  ;;  %v1898_v50 = vcombine.high %v1338_v2, %v1338_v2  ;;  %v5187_v5 = vld [vmem:[#allocation4_spill] sm:$0xff] }
 0x1a4   : > { %v2542_v16 = vmax.f32 %v1863_v13, %v3631_v23  ;;  %v2611_v31 = vmax.f32 %v4617_v63, %v4606_v32  ;;  %v2613_v9 = vmax.f32 %v4619_v62, %v4610_v57  ;;  %v1905_v52 = vrot.slane %v1338_v2, %v4147_v25 }
 0x1a5   : > { %v2612_v51 = vmax.f32 %v2540_v48, %v2548_v55  ;;  %v1912_v53 = vrot.slane %v1898_v50, %v4147_v25  ;;  %v1265_v49 = vmul.f32 %v4530_v11, %v3841_v26  ;;  %v5189_v17 = vmax.f32 %v5187_v5, %v5188_v59  ;;  %v5191_v5 = vld [vmem:[#allocation16_spill] sm:$0xff]  ;;  %v5192_v59 = vld [vmem:[#allocation14_spill] sm:$0xff] }
 0x1a6   : > { %v2614_v13 = vmax.f32 %v2542_v16, %v2550_v37  ;;  %v1913_v41 = vcombine.high %v1905_v52, %v1905_v52  ;;  %v3640_v14 = vrot.slane %v1905_v52, 9 }
 0x1a7   : > { %v2689_v45 = vsel %vm2688_vm2, %v5190_v1, %v5189_v17  ;;  %v4641_v30 = vrot.slane %v2612_v51, 7  ;;  %v1914_v23 = vcombine.high %v1912_v53, %v1912_v53  ;;  %v3642_v29 = vrot.slane %v1912_v53, 9 }
 0x1a8   : > { %v1304_v55 = vadd.f32 %v4541_v21, %v1265_v49  ;;  %v4644_v2 = vrot.slane %v2614_v13, 7  ;;  %v3641_v39 = vrot.slane %v1913_v41, 9  ;;  %v2551_v11 = vmax.f32 %v1905_v52, %v3640_v14  ;;  %v5194_v49 = vld [vmem:[#allocation18_spill] sm:$0xff]  ;;  %v5195_v14 = vld [vmem:[#allocation27_spill] sm:$0xff] }
 0x1a9   : > { %v2691_v26 = vsel %vm2690_vm3, %v5190_v1, %v2689_v45  ;;  %v3643_v48 = vrot.slane %v1914_v23, 9  ;;  %v4648_v50 = vmax.f32 %v1912_v53, %v3642_v29  ;;  %v5193_v21 = vmax.f32 %v5191_v5, %v5192_v59  ;;  %v5196_v29 = vld [vmem:[#allocation22_spill] sm:$0xff] }
 0x1aa   : > { %v1336_v37 = vmax.f32 %v1304_v55, 0.0  ;;  %v2552_v16 = vmax.f32 %v1913_v41, %v3641_v39  ;;  %v2693_v51 = vsel %vm2692_vm4, %v5190_v1, %v2691_v26  ;;  %v5197_v55 = vmax.f32 %v5195_v14, %v5196_v29  ;;  %v5198_v39 = vld [vmem:[#allocation33_spill] sm:$0xff] }
 0x1ab   : > { %v2720_v17 = vsel %vm2688_vm2, %v5194_v49, %v5193_v21  ;;  %v2554_v52 = vmax.f32 %v1914_v23, %v3643_v48  ;;  %v4660_v53 = vsel %vm2694_vm5, %v5190_v1, %v2693_v51  ;;  %v5199_v5 = vmax.f32 %v4401_v56, %v4384_v12 }
 0x1ac   : > { %v1864_v13 = vcombine.high %v1336_v37, %v1336_v37  ;;  %v1871_v45 = vrot.slane %v1336_v37, %v4147_v25  ;;  %v2721_v41 = vsel %vm2690_vm3, %v5194_v49, %v2720_v17  ;;  %v2748_v26 = vsel %vm2688_vm2, %v5198_v39, %v5197_v55 }
 0x1ad   : > { %v2776_v23 = vsel %vm2688_vm2, %v4418_v44, %v5199_v5  ;;  %v5200_v48 = vmax.f32 %v4453_v28, %v4429_v0  ;;  %v2722_v21 = vsel %vm2692_vm4, %v5194_v49, %v2721_v41  ;;  %v2749_v12 = vsel %vm2690_vm3, %v5198_v39, %v2748_v26 }
 0x1ae   : > { %v1878_v37 = vrot.slane %v1864_v13, %v4147_v25  ;;  %v1879_v51 = vcombine.high %v1871_v45, %v1871_v45  ;;  %v3632_v59 = vrot.slane %v1871_v45, 9  ;;  %v4684_v17 = vsel %vm2694_vm5, %v5194_v49, %v2722_v21 }
 0x1af   : > { %v2804_v1 = vsel %vm2688_vm2, %v4472_v27, %v5200_v48  ;;  %v2777_v56 = vsel %vm2690_vm3, %v4418_v44, %v2776_v23  ;;  %v2750_v41 = vsel %vm2692_vm4, %v5198_v39, %v2749_v12  ;;  %v5201_v26 = vmax.f32 %v4507_v22, %v4493_v36 }
 0x1b0   : > { %v2805_v0 = vsel %vm2690_vm3, %v4472_v27, %v2804_v1  ;;  %v1880_v28 = vcombine.high %v1878_v37, %v1878_v37  ;;  %v3633_v13 = vrot.slane %v1879_v51, 9  ;;  %v3634_v14 = vrot.slane %v1878_v37, 9 }
 0x1b1   : > { %v2543_v29 = vmax.f32 %v1871_v45, %v3632_v59  ;;  %v2778_v49 = vsel %vm2692_vm4, %v4418_v44, %v2777_v56  ;;  %v2806_v55 = vsel %vm2692_vm4, %v4472_v27, %v2805_v0  ;;  %v2832_v5 = vsel %vm2688_vm2, %v4525_v7, %v5201_v26 }
 0x1b2   : > { %v3635_v23 = vrot.slane %v1880_v28, 9  ;;  %v2544_v48 = vmax.f32 %v1879_v51, %v3633_v13  ;;  %v4703_v1 = vmax.f32 %v1878_v37, %v3634_v14  ;;  %v2751_v59 = vsel %vm2694_vm5, %v5198_v39, %v2750_v41 }
 0x1b3   : > { %v2615_v45 = vmax.f32 %v2543_v29, %v2551_v11  ;;  %v2779_v21 = vsel %vm2694_vm5, %v4418_v44, %v2778_v49  ;;  %v2807_v12 = vsel %vm2694_vm5, %v4472_v27, %v2806_v55  ;;  %v2833_v36 = vsel %vm2690_vm3, %v4525_v7, %v2832_v5  ;;  %v5203_v49 = vld [vmem:[#allocation6_spill] sm:$0xff]  ;;  %v5204_v55 = vld [vmem:[#allocation5_spill] sm:$0xff] }
 0x1b4   : > { %v2546_v22 = vmax.f32 %v1880_v28, %v3635_v23  ;;  %v2616_v56 = vmax.f32 %v2544_v48, %v2552_v16  ;;  %v2617_v51 = vmax.f32 %v4703_v1, %v4648_v50  ;;  %v2834_v11 = vsel %vm2692_vm4, %v4525_v7, %v2833_v36  ;;  %v5206_v5 = vld [vmem:[#allocation9_spill] sm:$0xff] }
 0x1b5   : > { %v2835_v39 = vsel %vm2694_vm5, %v4525_v7, %v2834_v11  ;;  %v5202_v44 = vmax.f32 %v4568_v42, %v4551_v19  ;;  %v2888_v16 = vsel %vm2688_vm2, %v4641_v30, %v2611_v31  ;;  %v2945_v37 = vcombine.low %v4660_v53, %v4684_v17 }
 0x1b6   : > { %v2618_v0 = vmax.f32 %v2546_v22, %v2554_v52  ;;  %v4731_v28 = vrot.slane %v2616_v56, 7  ;;  %v2889_v19 = vsel %vm2690_vm3, %v4641_v30, %v2888_v16  ;;  %v2954_v63 = vcombine.low %v2751_v59, %v2779_v21  ;;  %v5208_v59 = vld [vmem:[#allocation15_spill] sm:$0xff]  ;;  %v5212_v22 = vld [vmem:[#allocation24_spill] sm:$0xff] }
 0x1b7   : > { %v2860_v27 = vsel %vm2688_vm2, %v4590_v47, %v5202_v44  ;;  %v2890_v32 = vsel %vm2692_vm4, %v4641_v30, %v2889_v19  ;;  %v3954_v13 = vmov 1934713408   ;;  %v2963_v29 = vcombine.low %v2807_v12, %v2835_v39  ;;  %v5214_v12 = vld [vmem:[#allocation34_spill] sm:$0xff]  ;;  %v5216_v44 = vld [vmem:[#allocation40_spill] sm:$0xff] }
 0x1b8   : > { %v2861_v7 = vsel %vm2690_vm3, %v4590_v47, %v2860_v27  ;;  %v4743_v31 = vsel %vm2688_vm2, %v4731_v28, %v2615_v45  ;;  %v4745_v52 = vrot.slane %v2618_v0, 7  ;;  %v2891_v17 = vsel %vm2694_vm5, %v4641_v30, %v2890_v32  ;;  %v5207_v45 = vld [vmem:[#allocation17_spill] sm:$0xff]  ;;  %v5211_v30 = vld [vmem:[#allocation28_spill] sm:$0xff] }
 0x1b9   : > { %v2862_v42 = vsel %vm2692_vm4, %v4590_v47, %v2861_v7  ;;  %v2947_v14 = vunpack.c.l.s4 %v3954_v13  ;;  %v5205_v26 = vmax.f32 %v5203_v49, %v5204_v55  ;;  %v5209_v21 = vmax.f32 %v5207_v45, %v5208_v59 }
 0x1ba   : > { %v2863_v53 = vsel %vm2694_vm5, %v4590_v47, %v2862_v42  ;;  %v5210_v47 = vld [vmem:[#allocation19_spill] sm:$0xff]  ;;  %v5213_v56 = vmax.f32 %v5211_v30, %v5212_v22  ;;  %v5215_v39 = vmax.f32 %v4407_v43, %v4393_v4  ;;  %v5220_v45 = vmax.f32 %v4570_v18, %v4556_v60 }
 0x1bb   : > { %v2972_v41 = vcombine.low %v2863_v53, %v2891_v17  ;;  %v2699_v23 = vsel %vm2688_vm2, %v5206_v5, %v5205_v26  ;;  %v2727_v36 = vsel %vm2688_vm2, %v5210_v47, %v5209_v21  ;;  %v2948_v16 = vunpack.c.0.s8 %v2947_v14  ;;  %v5217_v53 = vld [vmem:[#allocation2_spill] sm:$0xff] }
 0x1bc   : > { %v2700_v48 = vsel %vm2690_vm3, %v5206_v5, %v2699_v23  ;;  %v2755_v11 = vsel %vm2688_vm2, %v5214_v12, %v5213_v56  ;;  %v2783_v27 = vsel %vm2688_vm2, %v5216_v44, %v5215_v39  ;;  %v2728_v7 = vsel %vm2690_vm3, %v5210_v47, %v2727_v36 }
 0x1bd   : > { %v2701_v0 = vsel %vm2692_vm4, %v5206_v5, %v2700_v48  ;;  %v2756_v19 = vsel %vm2690_vm3, %v5214_v12, %v2755_v11  ;;  %v2729_v32 = vsel %vm2692_vm4, %v5210_v47, %v2728_v7  ;;  %v2784_v43 = vsel %vm2690_vm3, %v5216_v44, %v2783_v27 }
 0x1be   : > { %v2702_v42 = vsel %vm2694_vm5, %v5206_v5, %v2701_v0  ;;  %v2757_v4 = vsel %vm2692_vm4, %v5214_v12, %v2756_v19  ;;  %v4788_v17 = vsub.s32 %v2948_v16, %v5217_v53  ;;  %v2730_v13 = vsel %vm2694_vm5, %v5210_v47, %v2729_v32  ;;  %v5221_v19 = vld [vmem:[#allocation13_spill] sm:$0xff]  ;;  %v5222_v32 = vld [vmem:[#allocation11_spill] sm:$0xff] }
 0x1bf   : > { %v2758_v14 = vsel %vm2694_vm5, %v5214_v12, %v2757_v4  ;;  %v2785_v49 = vsel %vm2692_vm4, %v5216_v44, %v2784_v43  ;;  %v5218_v26 = vmax.f32 %v4455_v40, %v4433_v8  ;;  %v5219_v23 = vmax.f32 %v4513_v46, %v4495_v33  ;;  %v5223_v53 = vld [vmem:[#allocation25_spill] sm:$0xff] }
 0x1c0   : > { %v2786_v55 = vsel %vm2694_vm5, %v5216_v44, %v2785_v49  ;;  %v2867_v59 = vsel %vm2688_vm2, %v4595_v38, %v5220_v45  ;;  %v4814_v21 = vrot.slane %v2945_v37, %v4788_v17  ;;  %v4817_v8 = vrot.slane %v2954_v63, %v4788_v17  ;;  %v5225_v49 = vld [vmem:[#allocation38_spill] sm:$0xff] }
 0x1c1   : > { %v2811_v5 = vsel %vm2688_vm2, %v4477_v34, %v5218_v26  ;;  %v2839_v48 = vsel %vm2688_vm2, %v4533_v35, %v5219_v23  ;;  %v4820_v40 = vrot.slane %v2963_v29, %v4788_v17  ;;  %v4823_v33 = vrot.slane %v2972_v41, %v4788_v17 }
 0x1c2   : > { %v2812_v46 = vsel %vm2690_vm3, %v4477_v34, %v2811_v5  ;;  %v2840_v60 = vsel %vm2690_vm3, %v4533_v35, %v2839_v48  ;;  %v2868_v18 = vsel %vm2690_vm3, %v4595_v38, %v2867_v59  ;;  %v2895_v37 = vsel %vm2688_vm2, %v4644_v2, %v2613_v9 }
 0x1c3   : > { %v3093_v63 = vcombine.low %v4814_v21, %v4817_v8  ;;  %v3644_v29 = vcombine.high %v4814_v21, %v4817_v8  ;;  %v3645_v41 = vcombine.high %v4820_v40, %v4823_v33  ;;  %v3094_v47 = vcombine.low %v4820_v40, %v4823_v33 }
 0x1c4   : > { %v2813_v36 = vsel %vm2692_vm4, %v4477_v34, %v2812_v46  ;;  %v2841_v57 = vsel %vm2692_vm4, %v4533_v35, %v2840_v60  ;;  %v2869_v62 = vsel %vm2692_vm4, %v4595_v38, %v2868_v18  ;;  %v2896_v9 = vsel %vm2690_vm3, %v4644_v2, %v2895_v37  ;;  %v5227_v18 = vld [vmem:[#allocation46_spill] sm:$0xff] }
 0x1c5   : > { %v3123_v30 = vrot.slane %v3644_v29, %v4147_v25  ;;  %v3130_v22 = vrot.slane %v3645_v41, %v4147_v25  ;;  %v2814_v56 = vsel %vm2694_vm5, %v4477_v34, %v2813_v36  ;;  %v2842_v12 = vsel %vm2694_vm5, %v4533_v35, %v2841_v57 }
 0x1c6   : > { %v2870_v11 = vsel %vm2694_vm5, %v4595_v38, %v2869_v62  ;;  %v2897_v39 = vsel %vm2692_vm4, %v4644_v2, %v2896_v9  ;;  %v2981_v44 = vcombine.low %v2702_v42, %v2730_v13  ;;  %v2990_v27 = vcombine.low %v2758_v14, %v2786_v55  ;;  %v5224_v13 = vld [vmem:[#allocation23_spill] sm:$0xff]  ;;  %v5226_v55 = vld [vmem:[#allocation37_spill] sm:$0xff] }
 0x1c7   : > { %v3131_v16 = vcombine.low %v3123_v30, %v3130_v22  ;;  %v2898_v0 = vsel %vm2694_vm5, %v4644_v2, %v2897_v39  ;;  %v2999_v7 = vcombine.low %v2814_v56, %v2842_v12  ;;  %v2707_v34 = vsel %vm2690_vm3, %v5222_v32, %v5221_v19  ;;  %v5228_v9 = vld [vmem:[#allocation51_spill] sm:$0xff]  ;;  %v5229_v30 = vld [vmem:[#allocation50_spill] sm:$0xff] }
 0x1c8   : > { %v4868_v4 = vrot.slane %v2981_v44, %v4788_v17  ;;  %v4871_v35 = vrot.slane %v2990_v27, %v4788_v17  ;;  %v3008_v38 = vcombine.low %v2870_v11, %v2898_v0  ;;  %v2708_v42 = vsel %vm2692_vm4, %v5222_v32, %v2707_v34  ;;  %v5230_v34 = vld [vmem:[#allocation10_spill] sm:$0xff] }
 0x1c9   : > { %3132 = vrot.lane.b32.xlu0 %v3131_v16, %s3955_s9  ;;  %v4877_v2 = vrot.slane %v2999_v7, %v4788_v17  ;;  %v2709_v43 = vsel %vm2694_vm5, %v5222_v32, %v2708_v42  ;;  %v2735_v14 = vsel %vm2690_vm3, %v5224_v13, %v5223_v53  ;;  %v2763_v26 = vsel %vm2690_vm3, %v5226_v55, %v5225_v49  ;;  %v5233_v53 = vld [vmem:[#allocation12_spill] sm:$0xff] }
 0x1ca   : > { %v4888_v5 = vrot.slane %v3008_v38, %v4788_v17  ;;  %v3139_v23 = vcombine.low %v4868_v4, %v4871_v35  ;;  %v2736_v48 = vsel %vm2692_vm4, %v5224_v13, %v2735_v14  ;;  %v2764_v45 = vsel %vm2692_vm4, %v5226_v55, %v2763_v26  ;;  %v5231_v38 = vld [vmem:[#allocation8_spill] sm:$0xff] }
 0x1cb   : > { %v2737_v59 = vsel %vm2694_vm5, %v5224_v13, %v2736_v48  ;;  %v2765_v46 = vsel %vm2694_vm5, %v5226_v55, %v2764_v45  ;;  %v2791_v60 = vsel %vm2690_vm3, %v4443_v58, %v4449_v10  ;;  %v2819_v37 = vsel %vm2690_vm3, %v5227_v18, %v4499_v61  ;;  %v5234_v13 = vld [vmem:[#allocation21_spill] sm:$0xff]  ;;  %v5235_v14 = vld [vmem:[#allocation20_spill] sm:$0xff] }
 0x1cc   : > { %v3140_v29 = vcombine.low %v4877_v2, %v4888_v5  ;;  %v3147_v41 = vrot.slane %v3139_v23, %v4147_v25  ;;  %v2792_v36 = vsel %vm2692_vm4, %v4443_v58, %v2791_v60  ;;  %v2820_v57 = vsel %vm2692_vm4, %v5227_v18, %v2819_v37  ;;  %v5238_v60 = vld [vmem:[#allocation36_spill] sm:$0xff] }
 0x1cd   : > { %v2793_v62 = vsel %vm2694_vm5, %v4443_v58, %v2792_v36  ;;  %v2821_v10 = vsel %vm2694_vm5, %v5227_v18, %v2820_v57  ;;  %v2847_v61 = vsel %vm2690_vm3, %v5229_v30, %v5228_v9  ;;  %v2875_v22 = vsel %vm2690_vm3, %v4615_v20, %v4625_v54  ;;  %v5239_v18 = vld [vmem:[#allocation35_spill] sm:$0xff] }
 0x1ce   : > { %v3154_v56 = vrot.slane %v3140_v29, %v4147_v25  ;;  %v2848_v12 = vsel %vm2692_vm4, %v5229_v30, %v2847_v61  ;;  %v2876_v11 = vsel %vm2692_vm4, %v4615_v20, %v2875_v22  ;;  %v2903_v58 = vsel %vm2690_vm3, %v4731_v28, %v4743_v31  ;;  %v5241_v29 = vld [vmem:[#allocation39_spill] sm:$0xff]  ;;  %v5242_v61 = vld [vmem:[#allocation42_spill] sm:$0xff]  ;;  %v5243_v22 = vld [vmem:[#allocation41_spill] sm:$0xff] }
 0x1cf   : > { %v2849_v39 = vsel %vm2694_vm5, %v5229_v30, %v2848_v12  ;;  %v2877_v44 = vsel %vm2694_vm5, %v4615_v20, %v2876_v11  ;;  %v2904_v54 = vsel %vm2692_vm4, %v4731_v28, %v2903_v58  ;;  %v3017_v27 = vcombine.low %v2709_v43, %v2737_v59  ;;  %v5237_v43 = vld [vmem:[#allocation26_spill] sm:$0xff]  ;;  %v5245_v12 = vld [vmem:[#allocation43_spill] sm:$0xff]  ;;  %v5246_v58 = vld [vmem:[#allocation45_spill] sm:$0xff] }
 0x1d0   : > { %v3155_v16 = vcombine.low %v3147_v41, %v3154_v56  ;;  %v2905_v0 = vsel %vm2694_vm5, %v4731_v28, %v2904_v54  ;;  %v3026_v7 = vcombine.low %v2765_v46, %v2793_v62  ;;  %v3035_v19 = vcombine.low %v2821_v10, %v2849_v39  ;;  %v5247_v39 = vld [vmem:[#allocation44_spill] sm:$0xff]  ;;  %v5249_v54 = vld [vmem:[#allocation47_spill] sm:$0xff] }
 0x1d1   : > { %v4940_v32 = vrot.slane %v3017_v27, %v4788_v17  ;;  %v3044_v31 = vcombine.low %v2877_v44, %v2905_v0  ;;  %v5232_v42 = vmax.f32 %v5230_v34, %v5231_v38  ;;  %v5236_v49 = vmax.f32 %v5234_v13, %v5235_v14  ;;  %v5253_v13 = vld [vmem:[#allocation52_spill] sm:$0xff] }
 0x1d2   : > { %3156 = vrot.lane.b32.xlu1 %v3155_v16, %s3956_s10  ;;  %v4954_v28 = vrot.slane %v3026_v7, %v4788_v17  ;;  %v4957_v26 = vrot.slane %v3035_v19, %v4788_v17  ;;  %v5240_v37 = vmax.f32 %v5238_v60, %v5239_v18  ;;  %v5244_v56 = vmax.f32 %v5242_v61, %v5243_v22 }
 0x1d3   : > { %v2713_v20 = vsel %vm2688_vm2, %v5233_v53, %v5232_v42  ;;  %v2741_v55 = vsel %vm2688_vm2, %v5237_v43, %v5236_v49  ;;  %v3051_v45 = vrot.slane %v3044_v31, %v4788_v17  ;;  %v5248_v44 = vmax.f32 %v5246_v58, %v5247_v39  ;;  %v5250_v42 = vld [vmem:[#allocation49_spill] sm:$0xff] }
 0x1d4   : > { %v2714_v23 = vsel %vm2690_vm3, %v5233_v53, %v2713_v20  ;;  %v2742_v48 = vsel %vm2690_vm3, %v5237_v43, %v2741_v55  ;;  %v2769_v41 = vsel %vm2688_vm2, %v5241_v29, %v5240_v37  ;;  %v3648_v36 = vcombine.high %v4940_v32, %v4954_v28 }
 0x1d5   : > { %v2715_v59 = vsel %vm2692_vm4, %v5233_v53, %v2714_v23  ;;  %v2743_v46 = vsel %vm2692_vm4, %v5237_v43, %v2742_v48  ;;  %v2770_v10 = vsel %vm2690_vm3, %v5241_v29, %v2769_v41  ;;  %v3649_v9 = vcombine.high %v4957_v26, %v3051_v45 }
 0x1d6   : > { %v2716_v57 = vsel %vm2694_vm5, %v5233_v53, %v2715_v59  ;;  %v2744_v62 = vsel %vm2694_vm5, %v5237_v43, %v2743_v46  ;;  %v2771_v30 = vsel %vm2692_vm4, %v5241_v29, %v2770_v10  ;;  %v2797_v11 = vsel %vm2688_vm2, %v5245_v12, %v5244_v56  ;;  %v5251_v53 = vld [vmem:[#allocation48_spill] sm:$0xff] }
 0x1d7   : > { %v2825_v27 = vsel %vm2688_vm2, %v5249_v54, %v5248_v44  ;;  %v3217_v16 = vrot.slane %v3648_v36, %v4147_v25  ;;  %v2772_v0 = vsel %vm2694_vm5, %v5241_v29, %v2771_v30  ;;  %v2798_v7 = vsel %vm2690_vm3, %v5245_v12, %v2797_v11 }
 0x1d8   : > { %v2826_v19 = vsel %vm2690_vm3, %v5249_v54, %v2825_v27  ;;  %v3224_v31 = vrot.slane %v3649_v9, %v4147_v25  ;;  %v2799_v34 = vsel %vm2692_vm4, %v5245_v12, %v2798_v7  ;;  %v5252_v20 = vmax.f32 %v5250_v42, %v5251_v53 }
 0x1d9   : > { %v2827_v38 = vsel %vm2692_vm4, %v5249_v54, %v2826_v19  ;;  %v2800_v49 = vsel %vm2694_vm5, %v5245_v12, %v2799_v34  ;;  %v2881_v23 = vsel %vm2688_vm2, %v4627_v24, %v2609_v15  ;;  %v2909_v60 = vsel %vm2688_vm2, %v4745_v52, %v2617_v51 }
 0x1da   : > { %v2853_v14 = vsel %vm2688_vm2, %v5253_v13, %v5252_v20  ;;  %v2828_v43 = vsel %vm2694_vm5, %v5249_v54, %v2827_v38  ;;  %v3225_v48 = vcombine.low %v3217_v16, %v3224_v31  ;;  %v2882_v46 = vsel %vm2690_vm3, %v4627_v24, %v2881_v23 }
 0x1db   : > { %v2854_v55 = vsel %vm2690_vm3, %v5253_v13, %v2853_v14  ;;  %v2883_v6 = vsel %vm2692_vm4, %v4627_v24, %v2882_v46  ;;  %v2910_v3 = vsel %vm2690_vm3, %v4745_v52, %v2909_v60  ;;  %v3053_v15 = vcombine.low %v2716_v57, %v2744_v62 }
 0x1dc   : > { %v2855_v59 = vsel %vm2692_vm4, %v5253_v13, %v2854_v55  ;;  %3226 = vrot.lane.b32.xlu0 %v3225_v48, %s3955_s9  ;;  %v2884_v37 = vsel %vm2694_vm5, %v4627_v24, %v2883_v6  ;;  %v2911_v50 = vsel %vm2692_vm4, %v4745_v52, %v2910_v3  ;;  %v3062_v1 = vcombine.low %v2772_v0, %v2800_v49 }
 0x1dd   : > { %v2856_v18 = vsel %vm2694_vm5, %v5253_v13, %v2855_v59  ;;  %v2912_v29 = vsel %vm2694_vm5, %v4745_v52, %v2911_v50  ;;  %v3646_v41 = vcombine.high %v4868_v4, %v4871_v35  ;;  %v3647_v36 = vcombine.high %v4877_v2, %v4888_v5 }
 0x1de   : > { %v3071_v51 = vcombine.low %v2828_v43, %v2856_v18  ;;  %v3060_v57 = vrot.slane %v3053_v15, %v4788_v17  ;;  %v3069_v62 = vrot.slane %v3062_v1, %v4788_v17  ;;  %v3080_v10 = vcombine.low %v2884_v37, %v2912_v29 }
 0x1df   : > { %v3171_v24 = vrot.slane %v3646_v41, %v4147_v25  ;;  %v3178_v9 = vrot.slane %v3647_v36, %v4147_v25  ;;  %v3101_v52 = vrot.slane %v3093_v63, %v4147_v25  ;;  %v3108_v4 = vrot.slane %v3094_v47, %v4147_v25 }
 0x1e0   : > { %v3078_v35 = vrot.slane %v3071_v51, %v4788_v17  ;;  %v3087_v2 = vrot.slane %v3080_v10, %v4788_v17  ;;  %v3233_v5 = vcombine.low %v3060_v57, %v3069_v62  ;;  %v3650_v30 = vcombine.high %v3060_v57, %v3069_v62 }
 0x1e1   : > { %v3179_v61 = vcombine.low %v3171_v24, %v3178_v9  ;;  %v3109_v22 = vcombine.low %v3101_v52, %v3108_v4  ;;  %v3187_v56 = vcombine.low %v4940_v32, %v4954_v28  ;;  %v3188_v12 = vcombine.low %v4957_v26, %v3051_v45 }
 0x1e2   : > { %v3234_v21 = vcombine.low %v3078_v35, %v3087_v2  ;;  %v3651_v8 = vcombine.high %v3078_v35, %v3087_v2  ;;  %v3241_v17 = vrot.slane %v3233_v5, %v4147_v25  ;;  %v3265_v47 = vrot.slane %v3650_v30, %v4147_v25 }
 0x1e3   : > { %3180 = vrot.lane.b32.xlu0 %v3179_v61, %s3957_s11  ;;  %v3195_v40 = vrot.slane %v3187_v56, %v4147_v25  ;;  %v3202_v33 = vrot.slane %v3188_v12, %v4147_v25 }
 0x1e4   : > { %v3248_v63 = vrot.slane %v3234_v21, %v4147_v25  ;;  %v3272_v11 = vrot.slane %v3651_v8, %v4147_v25 }
 0x1e5   : > { %v3203_v32 = vcombine.low %v3195_v40, %v3202_v33 }
 0x1e6   : > { %v3249_v28 = vcombine.low %v3241_v17, %v3248_v63  ;;  %v3273_v26 = vcombine.low %v3265_v47, %v3272_v11 }
 0x1e8   : > { %3250 = vrot.lane.b32.xlu1 %v3249_v28, %s3956_s10 }
 0x1ec   : > { %3274 = vrot.lane.b32.xlu1 %v3273_v26, %s3957_s11 }
 0x23b   : > { %v3133_v45 = vpop.permute.xlu0 %3132 }
 0x23c   : > { %v3278_v39 = vsel %vm3277_vm6, %v3109_v22, %v3133_v45 }
 0x244   : > { %v3157_v44 = vpop.permute.xlu1 %3156 }
 0x245   : > { %v3280_v54 = vsel %vm3279_vm7, %v3278_v39, %v3157_v44 }
 0x24e   : > { %v3227_v58 = vpop.permute.xlu0 %3226 }
 0x24f   : > { %v3283_v0 = vsel %vm3277_vm6, %v3203_v32, %v3227_v58 }
 0x255   : > { %v3181_v25 = vpop.permute.xlu0 %3180 }
 0x256   : > { %v3282_v27 = vsel %vm3281_vm8, %v3280_v54, %v3181_v25 }
 0x257   : > { %3286 = vst [vmem:[%s197_s17] sm:$0xff] %v3282_v27 }
 0x25a   : > { %v3251_v16 = vpop.permute.xlu1 %3250 }
 0x25b   : > { %v3284_v7 = vsel %vm3279_vm7, %v3283_v0, %v3251_v16 }
 0x25e   : > { %v3275_v19 = vpop.permute.xlu1 %3274 }
 0x25f   : > { %v3285_v31 = vsel %vm3281_vm8, %v3284_v7, %v3275_v19 }
 0x260   : > { %3287 = vst [vmem:[%s197_s17 + $0x8] sm:$0xff] %v3285_v31 }
 0x261 PF: > { %s14_s15 = sadd.s32 1, %s3951_s15  }
 0x262   : > { %p11_p4 = scmp.ge.s32.totalorder %s14_s15, 4  }
 0x264   :  { %13 = sbr.rel (!%p11_p4) target bundleno = 1 (0x1), region = 68 }

</bundles_post_ra>
